<compile_context>
chip_gen: v7x
topology: tpu7x:2x2x1
jax: 0.10.0
libtpu: 0.0.40
codegen_flags: <defaults>
</compile_context>

<pallas_src>
import functools

import jax
import jax.numpy as jnp
from jax import lax
from jax.experimental import pallas as pl
from jax.experimental.pallas import tpu as pltpu


def _round_up(a, m):
    return -(-a // m) * m


def _vmem_capacity_bytes():
    """Physical per-core VMEM (v5e/v6e: 128 MiB, v7x: 64 MiB) with fallback."""
    try:
        info = pltpu.get_tpu_info()
        cap = getattr(info, "vmem_capacity_bytes", None)
        if cap:
            return int(cap)
    except Exception:
        pass
    return 64 * 2**20          # conservative (v7x-sized) default


def _sep_conv_kernel(xc_ref, xh_ref, wdw_ref, dwb_ref, wpw_ref, pwb_ref,
                     o_ref, acc_ref, *, ksize, stride, rate, tile_ho, wo,
                     apply_relu, add_dw_bias, mxu_dtype, dw_dtype):
    """One (batch, row-tile) grid step.

    xc_ref: (s*s, tile_ho, Ws, Cdw)   phase-decomposed input rows of this tile
    xh_ref: (s*s, halo_rows, Ws, Cdw) halo rows just below this tile
    wdw_ref: (K*K, Cdw)               depthwise weights (BN scale pre-folded)
    dwb_ref: (1, Cdw)                 depthwise BN bias (zeros when folded)
    wpw_ref: (Cdw, Cout)              pointwise weights (BN scale pre-folded)
    pwb_ref: (1, Cout)                pointwise BN bias
    o_ref:   (tile_ho*wo, Cout)       lane/sublane-dense output slab
    acc_ref: (tile_ho, wo, Cdw) f32   VMEM scratch accumulator
    """
    cdw = acc_ref.shape[-1]
    s = stride

    # Single bounded accumulator buffer, zeroed once per grid step.
    acc_ref[...] = jnp.zeros_like(acc_ref)

    # --- depthwise conv; all slices are contiguous thanks to the wrapper's
    # stride-phase decomposition.  Halo rows come from the narrow xh_ref.
    # No concat temporaries: the straddling taps do two sliced += adds.
    for kh in range(ksize):
        for kw in range(ksize):
            h0, w0 = kh * rate, kw * rate
            ph = (h0 % s) * s + (w0 % s)
            roff, coff = h0 // s, w0 // s
            tap = kh * ksize + kw
            w_tap = wdw_ref[pl.ds(tap, 1), :]            # (1, Cdw), vld slack
            if roff == 0:
                xs = xc_ref[ph, :, pl.ds(coff, wo), :]
                acc_ref[...] += xs.astype(dw_dtype) * w_tap
            elif roff >= tile_ho:
                xs = xh_ref[ph, pl.ds(roff - tile_ho, tile_ho),
                            pl.ds(coff, wo), :]
                acc_ref[...] += xs.astype(dw_dtype) * w_tap
            else:
                top = xc_ref[ph, pl.ds(roff, tile_ho - roff),
                             pl.ds(coff, wo), :]
                bot = xh_ref[ph, pl.ds(0, roff), pl.ds(coff, wo), :]
                acc_ref[pl.ds(0, tile_ho - roff), :, :] += (
                    top.astype(dw_dtype) * w_tap)
                acc_ref[pl.ds(tile_ho - roff, roff), :, :] += (
                    bot.astype(dw_dtype) * w_tap)

    # --- depthwise BN bias (skipped when folded into pwb) + activation ---
    y = acc_ref[...]
    if add_dw_bias:
        y = y + dwb_ref[...]
    if apply_relu:
        y = jnp.maximum(y, 0.0)

    # --- pointwise 1x1 conv on the MXU (bf16 operands, f32 accumulation).
    # wo is a multiple of 8 and cdw a multiple of 128 -> free reshape.
    ym = y.reshape(tile_ho * wo, cdw).astype(mxu_dtype)
    z = jnp.dot(ym, wpw_ref[...], preferred_element_type=jnp.float32)

    # --- pointwise BN bias + activation ---
    z = z + pwb_ref[...]
    if apply_relu:
        z = jnp.maximum(z, 0.0)

    o_ref[...] = z.astype(o_ref.dtype)


def separable_conv2d_same(x_nchw, params, *, kernel_size, depth_multiplier,
                          stride, rate, use_explicit_padding=True,
                          apply_relu=False, bn_eps=1e-3, tile_ho=None,
                          mxu_dtype=jnp.bfloat16,
                          dw_compute_dtype=jnp.float32, out_dtype=None):
    """Forward pass matching SeparableConv2dSame (inference-mode BN).

    x_nchw: (B, Cin, H, W). Returns (B, Cout, Ho, Wo) in out_dtype (default
    x.dtype; pass jnp.bfloat16 to halve writeback bytes if downstream allows).
    dw_compute_dtype: set to jnp.bfloat16 for bf16 inputs on v6e/v7x (bf16
    VALU) -- keep f32 on v5e.
    """
    k = kernel_size
    s = stride
    x = jnp.transpose(x_nchw, (0, 2, 3, 1))              # NHWC
    b, h, w, cin = x.shape
    cdw = cin * depth_multiplier
    cout = params["w_pw"].shape[1]
    out_dtype = x.dtype if out_dtype is None else out_dtype

    # ---- padding (matches fixed_padding / PyTorch padding arg) ----
    without_padding = (s == 1) or (not use_explicit_padding)
    if without_padding:
        pad = (k - 1) * rate // 2
        pad_beg = pad_end = pad
    else:
        eff = k + (k - 1) * (rate - 1)
        pad_total = eff - 1
        pad_beg = pad_total // 2
        pad_end = pad_total - pad_beg
    hp = h + pad_beg + pad_end
    wp = w + pad_beg + pad_end
    eff = rate * (k - 1) + 1
    ho = (hp - eff) // s + 1
    wo = (wp - eff) // s + 1

    # ---- lane-aligned channel counts ----
    cdw_p = _round_up(cdw, 128)
    cout_p = _round_up(cout, 128)

    # ---- generation-aware budgets ----
    vmem_cap = _vmem_capacity_bytes()
    if vmem_cap <= 64 * 2**20:          # v7x-class: 64 MiB per TensorCore
        in_blk_budget = 8 * 2**20
        vmem_cap_limit = 40 * 2**20
        m_target = 256
    else:                               # v5e / v6e: 128 MiB
        in_blk_budget = 16 * 2**20
        vmem_cap_limit = 96 * 2**20
        m_target = 512

    # ---- tiling geometry (phase-space rows / cols) ----
    halo = ((k - 1) * rate) // s        # extra phase rows needed below tile
    halo_rows = max(halo, 1)
    wo_p = _round_up(wo, 8)             # sublane-aligned output width
    ws0 = -(-wp // s)
    ws_total = _round_up(max(ws0, halo + wo_p), 8)

    if tile_ho is None:
        tile_ho = max(8, -(-m_target // wo_p))   # MXU M = tile_ho*wo_p
        tile_ho = min(tile_ho, max(ho, 1))
    tile_ho = _round_up(max(int(tile_ho), 1), halo_rows)
    row_bytes = s * s * ws_total * cdw_p * x.dtype.itemsize
    max_tile = max(halo_rows,
                   (in_blk_budget // max(row_bytes, 1))
                   // halo_rows * halo_rows)
    tile_ho = min(tile_ho, max_tile)
    # keep >= 2 grid steps when possible so both TensorCores get work
    if b * (-(-ho // tile_ho)) < 2 and tile_ho > halo_rows:
        tile_ho = max(halo_rows, _round_up(-(-ho // 2), halo_rows))

    num_tiles = -(-ho // tile_ho)
    hs0 = -(-hp // s)
    hs_total = _round_up(max(hs0, num_tiles * tile_ho + halo_rows), tile_ho)

    # ---- pad + (stride > 1 only) stride-phase-decompose the input ----
    xp = jnp.pad(x, ((0, 0), (pad_beg, pad_end), (pad_beg, pad_end), (0, 0)))
    if depth_multiplier > 1:
        # PyTorch groups=Cin: depthwise out channel c reads input channel c//dm
        xp = jnp.repeat(xp, depth_multiplier, axis=-1)
    xp = jnp.pad(xp, ((0, 0), (0, hs_total * s - hp), (0, ws_total * s - wp),
                      (0, cdw_p - cdw)))
    if s == 1:
        xph = xp[:, None]                                 # (B,1,Hs,Ws,Cp), free
    else:
        xph = xp.reshape(b, hs_total, s, ws_total, s, cdw_p)
        xph = xph.transpose(0, 2, 4, 1, 3, 5).reshape(b, s * s, hs_total,
                                                      ws_total, cdw_p)

    # ---- fold BN scales into the weights (exact, wrapper-side) ----
    f32 = jnp.float32
    dw_scale = (params["dw_gamma"].astype(f32) /
                jnp.sqrt(params["dw_var"].astype(f32) + bn_eps))
    dw_bias = (params["dw_beta"].astype(f32)
               - params["dw_mean"].astype(f32) * dw_scale)
    pw_scale = (params["pw_gamma"].astype(f32) /
                jnp.sqrt(params["pw_var"].astype(f32) + bn_eps))
    pw_bias = (params["pw_beta"].astype(f32)
               - params["pw_mean"].astype(f32) * pw_scale)

    w_dw = params["w_dw"].astype(f32) * dw_scale[None, None, :]
    w_dw = jnp.pad(w_dw, ((0, 0), (0, 0), (0, cdw_p - cdw)))
    w_dw = w_dw.reshape(k * k, cdw_p).astype(dw_compute_dtype)

    w_pw_scaled = params["w_pw"].astype(f32) * pw_scale[None, :]
    w_pw = jnp.pad(w_pw_scaled,
                   ((0, cdw_p - cdw), (0, cout_p - cout))).astype(mxu_dtype)

    if apply_relu:
        add_dw_bias = True
        dwb = jnp.pad(dw_bias, (0, cdw_p - cdw)).reshape(1, cdw_p)
        pwb_full = pw_bias
    else:
        # no nonlinearity between the convs -> fold dw bias through pointwise
        add_dw_bias = False
        dwb = jnp.zeros((1, cdw_p), f32)
        pwb_full = pw_bias + dw_bias @ w_pw_scaled
    pwb = jnp.pad(pwb_full, (0, cout_p - cout)).reshape(1, cout_p)

    kernel = functools.partial(
        _sep_conv_kernel, ksize=k, stride=s, rate=rate, tile_ho=tile_ho,
        wo=wo_p, apply_relu=apply_relu, add_dw_bias=add_dw_bias,
        mxu_dtype=mxu_dtype, dw_dtype=dw_compute_dtype)

    hr = tile_ho // halo_rows
    m_rows = tile_ho * wo_p

    # ---- scoped-VMEM budget (double-buffered blocks + scratch + temporaries) ----
    dw_isz = jnp.dtype(dw_compute_dtype).itemsize
    mxu_isz = jnp.dtype(mxu_dtype).itemsize
    in_blk = s * s * tile_ho * ws_total * cdw_p * x.dtype.itemsize
    halo_blk = s * s * halo_rows * ws_total * cdw_p * x.dtype.itemsize
    w_bytes = (k * k * cdw_p * dw_isz + cdw_p * 4 + cout_p * 4
               + cdw_p * cout_p * mxu_isz)
    out_blk = m_rows * cout_p * jnp.dtype(out_dtype).itemsize
    acc_bytes = m_rows * cdw_p * 4
    interm = m_rows * cdw_p * (4 + dw_isz + mxu_isz) + m_rows * cout_p * 4
    vmem_est = 2 * (in_blk + halo_blk + out_blk + w_bytes) + acc_bytes + interm
    vmem_limit = int(min(vmem_cap_limit, max(32 * 2**20, 2 * vmem_est)))

    flops = int(2 * b * ho * wo * cdw * (cout + k * k))
    bytes_accessed = int(
        b * xph.shape[1] * hs_total * ws_total * cdw_p * x.dtype.itemsize
        + w_bytes
        + b * num_tiles * m_rows * cout_p * jnp.dtype(out_dtype).itemsize)

    out = pl.pallas_call(
        kernel,
        out_shape=jax.ShapeDtypeStruct((b, num_tiles, m_rows, cout_p),
                                       out_dtype),
        grid=(b, num_tiles),
        in_specs=[
            # current row tile of the phase-decomposed input
            pl.BlockSpec((None, s * s, tile_ho, ws_total, cdw_p),
                         lambda ib, it: (ib, 0, it, 0, 0)),
            # narrow halo block (only halo_rows extra rows of HBM traffic)
            pl.BlockSpec((None, s * s, halo_rows, ws_total, cdw_p),
                         lambda ib, it: (ib, 0, (it + 1) * hr, 0, 0)),
            pl.BlockSpec((k * k, cdw_p), lambda ib, it: (0, 0)),
            pl.BlockSpec((1, cdw_p), lambda ib, it: (0, 0)),
            pl.BlockSpec((cdw_p, cout_p), lambda ib, it: (0, 0)),
            pl.BlockSpec((1, cout_p), lambda ib, it: (0, 0)),
        ],
        # lane-dense (rows, Cout_pad) output slab; un-flattened in the wrapper
        out_specs=pl.BlockSpec((None, None, m_rows, cout_p),
                               lambda ib, it: (ib, it, 0, 0)),
        scratch_shapes=[pltpu.VMEM((tile_ho, wo_p, cdw_p), jnp.float32)],
        compiler_params=pltpu.CompilerParams(
            dimension_semantics=("parallel", "parallel"),
            vmem_limit_bytes=vmem_limit),
        cost_estimate=pl.CostEstimate(flops=flops, transcendentals=0,
                                      bytes_accessed=bytes_accessed),
    )(xph, xph, w_dw, dwb, w_pw, pwb)

    out = out.reshape(b, num_tiles * tile_ho, wo_p, cout_p)
    out = out[:, :ho, :wo, :cout]
    return jnp.transpose(out, (0, 3, 1, 2))               # back to NCHW


def _reference(x_nchw, p, *, kernel_size, depth_multiplier, stride, rate,
               use_explicit_padding, apply_relu, bn_eps=1e-3):
    """Pure-JAX (XLA conv) reference for correctness checking."""
    k = kernel_size
    x = jnp.transpose(x_nchw, (0, 2, 3, 1)).astype(jnp.float32)
    cin = x.shape[-1]
    without_padding = (stride == 1) or (not use_explicit_padding)
    if without_padding:
        pad = (k - 1) * rate // 2
        pads = ((pad, pad), (pad, pad))
    else:
        eff = k + (k - 1) * (rate - 1)
        tot = eff - 1
        pads = ((tot // 2, tot - tot // 2), (tot // 2, tot - tot // 2))
    y = lax.conv_general_dilated(
        x, p["w_dw"][:, :, None, :], window_strides=(stride, stride),
        padding=pads, rhs_dilation=(rate, rate), feature_group_count=cin,
        dimension_numbers=("NHWC", "HWIO", "NHWC"))
    y = ((y - p["dw_mean"]) / jnp.sqrt(p["dw_var"] + bn_eps) * p["dw_gamma"]
         + p["dw_beta"])
    if apply_relu:
        y = jax.nn.relu(y)
    y = jnp.einsum("bhwc,co->bhwo", y, p["w_pw"])
    y = ((y - p["pw_mean"]) / jnp.sqrt(p["pw_var"] + bn_eps) * p["pw_gamma"]
         + p["pw_beta"])
    if apply_relu:
        y = jax.nn.relu(y)
    return jnp.transpose(y, (0, 3, 1, 2))


if __name__ == "__main__":
    def make_params(key, k, cdw, cout):
        ks = jax.random.split(key, 10)
        return dict(
            w_dw=jax.random.normal(ks[0], (k, k, cdw), jnp.float32) * 0.2,
            dw_gamma=jax.random.uniform(ks[1], (cdw,), jnp.float32, 0.5, 1.5),
            dw_beta=jax.random.normal(ks[2], (cdw,), jnp.float32) * 0.1,
            dw_mean=jax.random.normal(ks[3], (cdw,), jnp.float32) * 0.1,
            dw_var=jax.random.uniform(ks[4], (cdw,), jnp.float32, 0.5, 1.5),
            w_pw=jax.random.normal(ks[5], (cdw, cout), jnp.float32) * 0.2,
            pw_gamma=jax.random.uniform(ks[6], (cout,), jnp.float32, 0.5, 1.5),
            pw_beta=jax.random.normal(ks[7], (cout,), jnp.float32) * 0.1,
            pw_mean=jax.random.normal(ks[8], (cout,), jnp.float32) * 0.1,
            pw_var=jax.random.uniform(ks[9], (cout,), jnp.float32, 0.5, 1.5),
        )

    # ---- Config A: stride-2, K=3, rate=1 (entry-flow style) ----
    kx, kp = jax.random.split(jax.random.PRNGKey(0))
    B, CIN, H, W = 2, 4, 16, 16
    K, DM, S, R, COUT = 3, 1, 2, 1, 8
    x = jax.random.normal(kx, (B, CIN, H, W), jnp.float32)
    p = make_params(kp, K, CIN * DM, COUT)

    # A1: f32-MXU path with ReLU: tight tolerance against the f32 reference.
    ref = _reference(x, p, kernel_size=K, depth_multiplier=DM, stride=S,
                     rate=R, use_explicit_padding=True, apply_relu=True)
    out32 = separable_conv2d_same(
        x, p, kernel_size=K, depth_multiplier=DM, stride=S, rate=R,
        use_explicit_padding=True, apply_relu=True, mxu_dtype=jnp.float32)
    out32 = jax.block_until_ready(out32)
    assert out32.shape == (B, COUT, 8, 8), out32.shape
    err32 = float(jnp.max(jnp.abs(out32 - ref)))
    assert jnp.allclose(out32, ref, atol=1e-4, rtol=1e-4), f"f32 err {err32}"

    # A2: bf16-MXU path, no activation (exercises the dw-bias fold).
    ref_nr = _reference(x, p, kernel_size=K, depth_multiplier=DM, stride=S,
                        rate=R, use_explicit_padding=True, apply_relu=False)
    out_nr = separable_conv2d_same(
        x, p, kernel_size=K, depth_multiplier=DM, stride=S, rate=R,
        use_explicit_padding=True, apply_relu=False)
    out_nr = jax.block_until_ready(out_nr)
    err_nr = float(jnp.max(jnp.abs(out_nr - ref_nr)))
    assert jnp.allclose(out_nr, ref_nr, atol=5e-2, rtol=5e-2), f"bf16 err {err_nr}"

    # ---- Config B: stride-1, atrous rate=2, depth_multiplier=2 ----
    # Exercises the no-phase-decomposition path and a multi-row halo
    # (straddling taps -> the two sliced accumulations).
    kx2, kp2 = jax.random.split(jax.random.PRNGKey(1))
    B2, CIN2, H2, W2 = 2, 4, 16, 16
    K2, DM2, S2, R2, COUT2 = 3, 2, 1, 2, 16
    x2 = jax.random.normal(kx2, (B2, CIN2, H2, W2), jnp.float32)
    p2 = make_params(kp2, K2, CIN2 * DM2, COUT2)
    ref2 = _reference(x2, p2, kernel_size=K2, depth_multiplier=DM2, stride=S2,
                      rate=R2, use_explicit_padding=True, apply_relu=True)
    out2 = separable_conv2d_same(
        x2, p2, kernel_size=K2, depth_multiplier=DM2, stride=S2, rate=R2,
        use_explicit_padding=True, apply_relu=True)
    out2 = jax.block_until_ready(out2)
    assert out2.shape == (B2, COUT2, H2, W2), out2.shape
    err2 = float(jnp.max(jnp.abs(out2 - ref2)))
    assert jnp.allclose(out2, ref2, atol=5e-2, rtol=5e-2), f"bf16 err {err2}"

    print("KERNEL_OK")
</pallas_src>

<mosaic_0001>
module attributes {stable_mosaic.version = 11 : i64} {
  func.func @_sep_conv_kernel(%arg0: i32, %arg1: i32, %arg2: memref<1x4x8x16x128xf32, #tpu.memory_space<vmem>>, %arg3: memref<1x4x1x16x128xf32, #tpu.memory_space<vmem>>, %arg4: memref<9x128xf32, #tpu.memory_space<vmem>>, %arg5: memref<1x128xf32, #tpu.memory_space<vmem>>, %arg6: memref<128x128xf32, #tpu.memory_space<vmem>>, %arg7: memref<1x128xf32, #tpu.memory_space<vmem>>, %arg8: memref<1x1x64x128xf32, #tpu.memory_space<vmem>>, %arg9: memref<8x8x128xf32, #tpu.memory_space<vmem>>) attributes {dimension_semantics = [#tpu.dimension_semantics<parallel>, #tpu.dimension_semantics<parallel>], iteration_bounds = array<i64: 2, 1>, scalar_prefetch = 0 : i64, scratch_operands = 1 : i64, tpu.core_type = #tpu.core_type<tc>, window_params = [{transform_indices = @transform_0, window_bounds = array<i64: 1, 4, 8, 16, 128>}, {transform_indices = @transform_1, window_bounds = array<i64: 1, 4, 1, 16, 128>}, {pipeline_mode = #tpu.pipeline_mode<synchronous>, transform_indices = @transform_2, window_bounds = array<i64: 9, 128>}, {pipeline_mode = #tpu.pipeline_mode<synchronous>, transform_indices = @transform_3, window_bounds = array<i64: 1, 128>}, {pipeline_mode = #tpu.pipeline_mode<synchronous>, transform_indices = @transform_4, window_bounds = array<i64: 128, 128>}, {pipeline_mode = #tpu.pipeline_mode<synchronous>, transform_indices = @transform_5, window_bounds = array<i64: 1, 128>}, {transform_indices = @transform_6, window_bounds = array<i64: 1, 1, 64, 128>}]} {
    %cst = arith.constant 0.000000e+00 : f32
    %0 = vector.broadcast %cst : f32 to vector<8x8x128xf32>
    %c0 = arith.constant 0 : index
    %c0_0 = arith.constant 0 : index
    %c0_1 = arith.constant 0 : index
    %1 = vector.load %arg9[%c0, %c0_0, %c0_1] : memref<8x8x128xf32, #tpu.memory_space<vmem>>, vector<8x8x128xf32>
    tpu.vector_store %arg9[%c0, %c0_0, %c0_1], %0 {strides = array<i32>} : memref<8x8x128xf32, #tpu.memory_space<vmem>>, vector<8x8x128xf32>,
    %c0_2 = arith.constant 0 : index
    %c0_3 = arith.constant 0 : index
    %2 = vector.load %arg4[%c0_2, %c0_3] : memref<9x128xf32, #tpu.memory_space<vmem>>, vector<1x128xf32>
    %c0_4 = arith.constant 0 : index
    %c0_5 = arith.constant 0 : index
    %c0_6 = arith.constant 0 : index
    %c0_7 = arith.constant 0 : index
    %c0_8 = arith.constant 0 : index
    %3 = vector.load %arg2[%c0_4, %c0_5, %c0_6, %c0_7, %c0_8] : memref<1x4x8x16x128xf32, #tpu.memory_space<vmem>>, vector<1x1x8x8x128xf32>
    %4 = vector.shape_cast %3 : vector<1x1x8x8x128xf32> to vector<8x8x128xf32>
    %c0_9 = arith.constant 0 : index
    %c0_10 = arith.constant 0 : index
    %c0_11 = arith.constant 0 : index
    %5 = vector.load %arg9[%c0_9, %c0_10, %c0_11] : memref<8x8x128xf32, #tpu.memory_space<vmem>>, vector<8x8x128xf32>
    %6 = vector.shape_cast %2 : vector<1x128xf32> to vector<1x1x128xf32>
    %7 = vector.broadcast %6 : vector<1x1x128xf32> to vector<8x8x128xf32>
    %8 = arith.mulf %4, %7 : vector<8x8x128xf32>
    %9 = arith.addf %5, %8 : vector<8x8x128xf32>
    %c0_12 = arith.constant 0 : index
    %c0_13 = arith.constant 0 : index
    %c0_14 = arith.constant 0 : index
    %10 = vector.load %arg9[%c0_12, %c0_13, %c0_14] : memref<8x8x128xf32, #tpu.memory_space<vmem>>, vector<8x8x128xf32>
    tpu.vector_store %arg9[%c0_12, %c0_13, %c0_14], %9 {strides = array<i32>} : memref<8x8x128xf32, #tpu.memory_space<vmem>>, vector<8x8x128xf32>,
    %c1 = arith.constant 1 : index
    %c0_15 = arith.constant 0 : index
    %11 = vector.load %arg4[%c1, %c0_15] : memref<9x128xf32, #tpu.memory_space<vmem>>, vector<1x128xf32>
    %c0_16 = arith.constant 0 : index
    %c1_17 = arith.constant 1 : index
    %c0_18 = arith.constant 0 : index
    %c0_19 = arith.constant 0 : index
    %c0_20 = arith.constant 0 : index
    %12 = vector.load %arg2[%c0_16, %c1_17, %c0_18, %c0_19, %c0_20] : memref<1x4x8x16x128xf32, #tpu.memory_space<vmem>>, vector<1x1x8x8x128xf32>
    %13 = vector.shape_cast %12 : vector<1x1x8x8x128xf32> to vector<8x8x128xf32>
    %c0_21 = arith.constant 0 : index
    %c0_22 = arith.constant 0 : index
    %c0_23 = arith.constant 0 : index
    %14 = vector.load %arg9[%c0_21, %c0_22, %c0_23] : memref<8x8x128xf32, #tpu.memory_space<vmem>>, vector<8x8x128xf32>
    %15 = vector.shape_cast %11 : vector<1x128xf32> to vector<1x1x128xf32>
    %16 = vector.broadcast %15 : vector<1x1x128xf32> to vector<8x8x128xf32>
    %17 = arith.mulf %13, %16 : vector<8x8x128xf32>
    %18 = arith.addf %14, %17 : vector<8x8x128xf32>
    %c0_24 = arith.constant 0 : index
    %c0_25 = arith.constant 0 : index
    %c0_26 = arith.constant 0 : index
    %19 = vector.load %arg9[%c0_24, %c0_25, %c0_26] : memref<8x8x128xf32, #tpu.memory_space<vmem>>, vector<8x8x128xf32>
    tpu.vector_store %arg9[%c0_24, %c0_25, %c0_26], %18 {strides = array<i32>} : memref<8x8x128xf32, #tpu.memory_space<vmem>>, vector<8x8x128xf32>,
    %c2 = arith.constant 2 : index
    %c0_27 = arith.constant 0 : index
    %20 = vector.load %arg4[%c2, %c0_27] : memref<9x128xf32, #tpu.memory_space<vmem>>, vector<1x128xf32>
    %c0_28 = arith.constant 0 : index
    %c0_29 = arith.constant 0 : index
    %c0_30 = arith.constant 0 : index
    %c1_31 = arith.constant 1 : index
    %c0_32 = arith.constant 0 : index
    %21 = vector.load %arg2[%c0_28, %c0_29, %c0_30, %c1_31, %c0_32] : memref<1x4x8x16x128xf32, #tpu.memory_space<vmem>>, vector<1x1x8x8x128xf32>
    %22 = vector.shape_cast %21 : vector<1x1x8x8x128xf32> to vector<8x8x128xf32>
    %c0_33 = arith.constant 0 : index
    %c0_34 = arith.constant 0 : index
    %c0_35 = arith.constant 0 : index
    %23 = vector.load %arg9[%c0_33, %c0_34, %c0_35] : memref<8x8x128xf32, #tpu.memory_space<vmem>>, vector<8x8x128xf32>
    %24 = vector.shape_cast %20 : vector<1x128xf32> to vector<1x1x128xf32>
    %25 = vector.broadcast %24 : vector<1x1x128xf32> to vector<8x8x128xf32>
    %26 = arith.mulf %22, %25 : vector<8x8x128xf32>
    %27 = arith.addf %23, %26 : vector<8x8x128xf32>
    %c0_36 = arith.constant 0 : index
    %c0_37 = arith.constant 0 : index
    %c0_38 = arith.constant 0 : index
    %28 = vector.load %arg9[%c0_36, %c0_37, %c0_38] : memref<8x8x128xf32, #tpu.memory_space<vmem>>, vector<8x8x128xf32>
    tpu.vector_store %arg9[%c0_36, %c0_37, %c0_38], %27 {strides = array<i32>} : memref<8x8x128xf32, #tpu.memory_space<vmem>>, vector<8x8x128xf32>,
    %c3 = arith.constant 3 : index
    %c0_39 = arith.constant 0 : index
    %29 = vector.load %arg4[%c3, %c0_39] : memref<9x128xf32, #tpu.memory_space<vmem>>, vector<1x128xf32>
    %c0_40 = arith.constant 0 : index
    %c2_41 = arith.constant 2 : index
    %c0_42 = arith.constant 0 : index
    %c0_43 = arith.constant 0 : index
    %c0_44 = arith.constant 0 : index
    %30 = vector.load %arg2[%c0_40, %c2_41, %c0_42, %c0_43, %c0_44] : memref<1x4x8x16x128xf32, #tpu.memory_space<vmem>>, vector<1x1x8x8x128xf32>
    %31 = vector.shape_cast %30 : vector<1x1x8x8x128xf32> to vector<8x8x128xf32>
    %c0_45 = arith.constant 0 : index
    %c0_46 = arith.constant 0 : index
    %c0_47 = arith.constant 0 : index
    %32 = vector.load %arg9[%c0_45, %c0_46, %c0_47] : memref<8x8x128xf32, #tpu.memory_space<vmem>>, vector<8x8x128xf32>
    %33 = vector.shape_cast %29 : vector<1x128xf32> to vector<1x1x128xf32>
    %34 = vector.broadcast %33 : vector<1x1x128xf32> to vector<8x8x128xf32>
    %35 = arith.mulf %31, %34 : vector<8x8x128xf32>
    %36 = arith.addf %32, %35 : vector<8x8x128xf32>
    %c0_48 = arith.constant 0 : index
    %c0_49 = arith.constant 0 : index
    %c0_50 = arith.constant 0 : index
    %37 = vector.load %arg9[%c0_48, %c0_49, %c0_50] : memref<8x8x128xf32, #tpu.memory_space<vmem>>, vector<8x8x128xf32>
    tpu.vector_store %arg9[%c0_48, %c0_49, %c0_50], %36 {strides = array<i32>} : memref<8x8x128xf32, #tpu.memory_space<vmem>>, vector<8x8x128xf32>,
    %c4 = arith.constant 4 : index
    %c0_51 = arith.constant 0 : index
    %38 = vector.load %arg4[%c4, %c0_51] : memref<9x128xf32, #tpu.memory_space<vmem>>, vector<1x128xf32>
    %c0_52 = arith.constant 0 : index
    %c3_53 = arith.constant 3 : index
    %c0_54 = arith.constant 0 : index
    %c0_55 = arith.constant 0 : index
    %c0_56 = arith.constant 0 : index
    %39 = vector.load %arg2[%c0_52, %c3_53, %c0_54, %c0_55, %c0_56] : memref<1x4x8x16x128xf32, #tpu.memory_space<vmem>>, vector<1x1x8x8x128xf32>
    %40 = vector.shape_cast %39 : vector<1x1x8x8x128xf32> to vector<8x8x128xf32>
    %c0_57 = arith.constant 0 : index
    %c0_58 = arith.constant 0 : index
    %c0_59 = arith.constant 0 : index
    %41 = vector.load %arg9[%c0_57, %c0_58, %c0_59] : memref<8x8x128xf32, #tpu.memory_space<vmem>>, vector<8x8x128xf32>
    %42 = vector.shape_cast %38 : vector<1x128xf32> to vector<1x1x128xf32>
    %43 = vector.broadcast %42 : vector<1x1x128xf32> to vector<8x8x128xf32>
    %44 = arith.mulf %40, %43 : vector<8x8x128xf32>
    %45 = arith.addf %41, %44 : vector<8x8x128xf32>
    %c0_60 = arith.constant 0 : index
    %c0_61 = arith.constant 0 : index
    %c0_62 = arith.constant 0 : index
    %46 = vector.load %arg9[%c0_60, %c0_61, %c0_62] : memref<8x8x128xf32, #tpu.memory_space<vmem>>, vector<8x8x128xf32>
    tpu.vector_store %arg9[%c0_60, %c0_61, %c0_62], %45 {strides = array<i32>} : memref<8x8x128xf32, #tpu.memory_space<vmem>>, vector<8x8x128xf32>,
    %c5 = arith.constant 5 : index
    %c0_63 = arith.constant 0 : index
    %47 = vector.load %arg4[%c5, %c0_63] : memref<9x128xf32, #tpu.memory_space<vmem>>, vector<1x128xf32>
    %c0_64 = arith.constant 0 : index
    %c2_65 = arith.constant 2 : index
    %c0_66 = arith.constant 0 : index
    %c1_67 = arith.constant 1 : index
    %c0_68 = arith.constant 0 : index
    %48 = vector.load %arg2[%c0_64, %c2_65, %c0_66, %c1_67, %c0_68] : memref<1x4x8x16x128xf32, #tpu.memory_space<vmem>>, vector<1x1x8x8x128xf32>
    %49 = vector.shape_cast %48 : vector<1x1x8x8x128xf32> to vector<8x8x128xf32>
    %c0_69 = arith.constant 0 : index
    %c0_70 = arith.constant 0 : index
    %c0_71 = arith.constant 0 : index
    %50 = vector.load %arg9[%c0_69, %c0_70, %c0_71] : memref<8x8x128xf32, #tpu.memory_space<vmem>>, vector<8x8x128xf32>
    %51 = vector.shape_cast %47 : vector<1x128xf32> to vector<1x1x128xf32>
    %52 = vector.broadcast %51 : vector<1x1x128xf32> to vector<8x8x128xf32>
    %53 = arith.mulf %49, %52 : vector<8x8x128xf32>
    %54 = arith.addf %50, %53 : vector<8x8x128xf32>
    %c0_72 = arith.constant 0 : index
    %c0_73 = arith.constant 0 : index
    %c0_74 = arith.constant 0 : index
    %55 = vector.load %arg9[%c0_72, %c0_73, %c0_74] : memref<8x8x128xf32, #tpu.memory_space<vmem>>, vector<8x8x128xf32>
    tpu.vector_store %arg9[%c0_72, %c0_73, %c0_74], %54 {strides = array<i32>} : memref<8x8x128xf32, #tpu.memory_space<vmem>>, vector<8x8x128xf32>,
    %c6 = arith.constant 6 : index
    %c0_75 = arith.constant 0 : index
    %56 = vector.load %arg4[%c6, %c0_75] : memref<9x128xf32, #tpu.memory_space<vmem>>, vector<1x128xf32>
    %c0_76 = arith.constant 0 : index
    %c0_77 = arith.constant 0 : index
    %c1_78 = arith.constant 1 : index
    %c0_79 = arith.constant 0 : index
    %c0_80 = arith.constant 0 : index
    %57 = vector.load %arg2[%c0_76, %c0_77, %c1_78, %c0_79, %c0_80] : memref<1x4x8x16x128xf32, #tpu.memory_space<vmem>>, vector<1x1x7x8x128xf32>
    %58 = vector.shape_cast %57 : vector<1x1x7x8x128xf32> to vector<7x8x128xf32>
    %c0_81 = arith.constant 0 : index
    %c0_82 = arith.constant 0 : index
    %c0_83 = arith.constant 0 : index
    %c0_84 = arith.constant 0 : index
    %c0_85 = arith.constant 0 : index
    %59 = vector.load %arg3[%c0_81, %c0_82, %c0_83, %c0_84, %c0_85] : memref<1x4x1x16x128xf32, #tpu.memory_space<vmem>>, vector<1x1x1x8x128xf32>
    %60 = vector.shape_cast %59 : vector<1x1x1x8x128xf32> to vector<1x8x128xf32>
    %c0_86 = arith.constant 0 : index
    %c0_87 = arith.constant 0 : index
    %c0_88 = arith.constant 0 : index
    %61 = vector.load %arg9[%c0_86, %c0_87, %c0_88] : memref<8x8x128xf32, #tpu.memory_space<vmem>>, vector<7x8x128xf32>
    %62 = vector.shape_cast %56 : vector<1x128xf32> to vector<1x1x128xf32>
    %63 = vector.broadcast %62 : vector<1x1x128xf32> to vector<7x8x128xf32>
    %64 = arith.mulf %58, %63 : vector<7x8x128xf32>
    %65 = arith.addf %61, %64 : vector<7x8x128xf32>
    %c0_89 = arith.constant 0 : index
    %c0_90 = arith.constant 0 : index
    %c0_91 = arith.constant 0 : index
    %66 = vector.load %arg9[%c0_89, %c0_90, %c0_91] : memref<8x8x128xf32, #tpu.memory_space<vmem>>, vector<7x8x128xf32>
    tpu.vector_store %arg9[%c0_89, %c0_90, %c0_91], %65 {strides = array<i32>} : memref<8x8x128xf32, #tpu.memory_space<vmem>>, vector<7x8x128xf32>,
    %c7 = arith.constant 7 : index
    %c0_92 = arith.constant 0 : index
    %c0_93 = arith.constant 0 : index
    %67 = vector.load %arg9[%c7, %c0_92, %c0_93] : memref<8x8x128xf32, #tpu.memory_space<vmem>>, vector<1x8x128xf32>
    %68 = vector.shape_cast %56 : vector<1x128xf32> to vector<1x1x128xf32>
    %69 = vector.broadcast %68 : vector<1x1x128xf32> to vector<1x8x128xf32>
    %70 = arith.mulf %60, %69 : vector<1x8x128xf32>
    %71 = arith.addf %67, %70 : vector<1x8x128xf32>
    %c7_94 = arith.constant 7 : index
    %c0_95 = arith.constant 0 : index
    %c0_96 = arith.constant 0 : index
    %72 = vector.load %arg9[%c7_94, %c0_95, %c0_96] : memref<8x8x128xf32, #tpu.memory_space<vmem>>, vector<1x8x128xf32>
    tpu.vector_store %arg9[%c7_94, %c0_95, %c0_96], %71 {strides = array<i32>} : memref<8x8x128xf32, #tpu.memory_space<vmem>>, vector<1x8x128xf32>,
    %c7_97 = arith.constant 7 : index
    %c0_98 = arith.constant 0 : index
    %73 = vector.load %arg4[%c7_97, %c0_98] : memref<9x128xf32, #tpu.memory_space<vmem>>, vector<1x128xf32>
    %c0_99 = arith.constant 0 : index
    %c1_100 = arith.constant 1 : index
    %c1_101 = arith.constant 1 : index
    %c0_102 = arith.constant 0 : index
    %c0_103 = arith.constant 0 : index
    %74 = vector.load %arg2[%c0_99, %c1_100, %c1_101, %c0_102, %c0_103] : memref<1x4x8x16x128xf32, #tpu.memory_space<vmem>>, vector<1x1x7x8x128xf32>
    %75 = vector.shape_cast %74 : vector<1x1x7x8x128xf32> to vector<7x8x128xf32>
    %c0_104 = arith.constant 0 : index
    %c1_105 = arith.constant 1 : index
    %c0_106 = arith.constant 0 : index
    %c0_107 = arith.constant 0 : index
    %c0_108 = arith.constant 0 : index
    %76 = vector.load %arg3[%c0_104, %c1_105, %c0_106, %c0_107, %c0_108] : memref<1x4x1x16x128xf32, #tpu.memory_space<vmem>>, vector<1x1x1x8x128xf32>
    %77 = vector.shape_cast %76 : vector<1x1x1x8x128xf32> to vector<1x8x128xf32>
    %c0_109 = arith.constant 0 : index
    %c0_110 = arith.constant 0 : index
    %c0_111 = arith.constant 0 : index
    %78 = vector.load %arg9[%c0_109, %c0_110, %c0_111] : memref<8x8x128xf32, #tpu.memory_space<vmem>>, vector<7x8x128xf32>
    %79 = vector.shape_cast %73 : vector<1x128xf32> to vector<1x1x128xf32>
    %80 = vector.broadcast %79 : vector<1x1x128xf32> to vector<7x8x128xf32>
    %81 = arith.mulf %75, %80 : vector<7x8x128xf32>
    %82 = arith.addf %78, %81 : vector<7x8x128xf32>
    %c0_112 = arith.constant 0 : index
    %c0_113 = arith.constant 0 : index
    %c0_114 = arith.constant 0 : index
    %83 = vector.load %arg9[%c0_112, %c0_113, %c0_114] : memref<8x8x128xf32, #tpu.memory_space<vmem>>, vector<7x8x128xf32>
    tpu.vector_store %arg9[%c0_112, %c0_113, %c0_114], %82 {strides = array<i32>} : memref<8x8x128xf32, #tpu.memory_space<vmem>>, vector<7x8x128xf32>,
    %c7_115 = arith.constant 7 : index
    %c0_116 = arith.constant 0 : index
    %c0_117 = arith.constant 0 : index
    %84 = vector.load %arg9[%c7_115, %c0_116, %c0_117] : memref<8x8x128xf32, #tpu.memory_space<vmem>>, vector<1x8x128xf32>
    %85 = vector.shape_cast %73 : vector<1x128xf32> to vector<1x1x128xf32>
    %86 = vector.broadcast %85 : vector<1x1x128xf32> to vector<1x8x128xf32>
    %87 = arith.mulf %77, %86 : vector<1x8x128xf32>
    %88 = arith.addf %84, %87 : vector<1x8x128xf32>
    %c7_118 = arith.constant 7 : index
    %c0_119 = arith.constant 0 : index
    %c0_120 = arith.constant 0 : index
    %89 = vector.load %arg9[%c7_118, %c0_119, %c0_120] : memref<8x8x128xf32, #tpu.memory_space<vmem>>, vector<1x8x128xf32>
    tpu.vector_store %arg9[%c7_118, %c0_119, %c0_120], %88 {strides = array<i32>} : memref<8x8x128xf32, #tpu.memory_space<vmem>>, vector<1x8x128xf32>,
    %c8 = arith.constant 8 : index
    %c0_121 = arith.constant 0 : index
    %90 = vector.load %arg4[%c8, %c0_121] : memref<9x128xf32, #tpu.memory_space<vmem>>, vector<1x128xf32>
    %c0_122 = arith.constant 0 : index
    %c0_123 = arith.constant 0 : index
    %c1_124 = arith.constant 1 : index
    %c1_125 = arith.constant 1 : index
    %c0_126 = arith.constant 0 : index
    %91 = vector.load %arg2[%c0_122, %c0_123, %c1_124, %c1_125, %c0_126] : memref<1x4x8x16x128xf32, #tpu.memory_space<vmem>>, vector<1x1x7x8x128xf32>
    %92 = vector.shape_cast %91 : vector<1x1x7x8x128xf32> to vector<7x8x128xf32>
    %c0_127 = arith.constant 0 : index
    %c0_128 = arith.constant 0 : index
    %c0_129 = arith.constant 0 : index
    %c1_130 = arith.constant 1 : index
    %c0_131 = arith.constant 0 : index
    %93 = vector.load %arg3[%c0_127, %c0_128, %c0_129, %c1_130, %c0_131] : memref<1x4x1x16x128xf32, #tpu.memory_space<vmem>>, vector<1x1x1x8x128xf32>
    %94 = vector.shape_cast %93 : vector<1x1x1x8x128xf32> to vector<1x8x128xf32>
    %c0_132 = arith.constant 0 : index
    %c0_133 = arith.constant 0 : index
    %c0_134 = arith.constant 0 : index
    %95 = vector.load %arg9[%c0_132, %c0_133, %c0_134] : memref<8x8x128xf32, #tpu.memory_space<vmem>>, vector<7x8x128xf32>
    %96 = vector.shape_cast %90 : vector<1x128xf32> to vector<1x1x128xf32>
    %97 = vector.broadcast %96 : vector<1x1x128xf32> to vector<7x8x128xf32>
    %98 = arith.mulf %92, %97 : vector<7x8x128xf32>
    %99 = arith.addf %95, %98 : vector<7x8x128xf32>
    %c0_135 = arith.constant 0 : index
    %c0_136 = arith.constant 0 : index
    %c0_137 = arith.constant 0 : index
    %100 = vector.load %arg9[%c0_135, %c0_136, %c0_137] : memref<8x8x128xf32, #tpu.memory_space<vmem>>, vector<7x8x128xf32>
    tpu.vector_store %arg9[%c0_135, %c0_136, %c0_137], %99 {strides = array<i32>} : memref<8x8x128xf32, #tpu.memory_space<vmem>>, vector<7x8x128xf32>,
    %c7_138 = arith.constant 7 : index
    %c0_139 = arith.constant 0 : index
    %c0_140 = arith.constant 0 : index
    %101 = vector.load %arg9[%c7_138, %c0_139, %c0_140] : memref<8x8x128xf32, #tpu.memory_space<vmem>>, vector<1x8x128xf32>
    %102 = vector.shape_cast %90 : vector<1x128xf32> to vector<1x1x128xf32>
    %103 = vector.broadcast %102 : vector<1x1x128xf32> to vector<1x8x128xf32>
    %104 = arith.mulf %94, %103 : vector<1x8x128xf32>
    %105 = arith.addf %101, %104 : vector<1x8x128xf32>
    %c7_141 = arith.constant 7 : index
    %c0_142 = arith.constant 0 : index
    %c0_143 = arith.constant 0 : index
    %106 = vector.load %arg9[%c7_141, %c0_142, %c0_143] : memref<8x8x128xf32, #tpu.memory_space<vmem>>, vector<1x8x128xf32>
    tpu.vector_store %arg9[%c7_141, %c0_142, %c0_143], %105 {strides = array<i32>} : memref<8x8x128xf32, #tpu.memory_space<vmem>>, vector<1x8x128xf32>,
    %c0_144 = arith.constant 0 : index
    %c0_145 = arith.constant 0 : index
    %c0_146 = arith.constant 0 : index
    %107 = vector.load %arg9[%c0_144, %c0_145, %c0_146] : memref<8x8x128xf32, #tpu.memory_space<vmem>>, vector<8x8x128xf32>
    %c0_147 = arith.constant 0 : index
    %c0_148 = arith.constant 0 : index
    %108 = vector.load %arg5[%c0_147, %c0_148] : memref<1x128xf32, #tpu.memory_space<vmem>>, vector<1x128xf32>
    %109 = vector.shape_cast %108 : vector<1x128xf32> to vector<1x1x128xf32>
    %110 = vector.broadcast %109 : vector<1x1x128xf32> to vector<8x8x128xf32>
    %111 = arith.addf %107, %110 : vector<8x8x128xf32>
    %cst_149 = arith.constant 0.000000e+00 : f32
    %112 = vector.broadcast %cst_149 : f32 to vector<8x8x128xf32>
    %113 = arith.maximumf %111, %112 : vector<8x8x128xf32>
    %114 = vector.shape_cast %113 : vector<8x8x128xf32> to vector<64x128xf32>
    %c0_150 = arith.constant 0 : index
    %c0_151 = arith.constant 0 : index
    %115 = vector.load %arg6[%c0_150, %c0_151] : memref<128x128xf32, #tpu.memory_space<vmem>>, vector<128x128xf32>
    %cst_152 = arith.constant dense<0.000000e+00> : vector<64x128xf32>
    %116 = tpu.matmul %114, %115, %cst_152 {dimension_numbers = #tpu.dot_dimension_numbers<[1], [0], [0], [1], [0, 0, 1, 1], [], []>} : vector<64x128xf32>, vector<128x128xf32>, vector<64x128xf32> -> vector<64x128xf32>
    %c0_153 = arith.constant 0 : index
    %c0_154 = arith.constant 0 : index
    %117 = vector.load %arg7[%c0_153, %c0_154] : memref<1x128xf32, #tpu.memory_space<vmem>>, vector<1x128xf32>
    %118 = vector.broadcast %117 : vector<1x128xf32> to vector<64x128xf32>
    %119 = arith.addf %116, %118 : vector<64x128xf32>
    %cst_155 = arith.constant 0.000000e+00 : f32
    %120 = vector.broadcast %cst_155 : f32 to vector<64x128xf32>
    %121 = arith.maximumf %119, %120 : vector<64x128xf32>
    %c0_156 = arith.constant 0 : index
    %c0_157 = arith.constant 0 : index
    %c0_158 = arith.constant 0 : index
    %c0_159 = arith.constant 0 : index
    %122 = vector.load %arg8[%c0_156, %c0_157, %c0_158, %c0_159] : memref<1x1x64x128xf32, #tpu.memory_space<vmem>>, vector<1x1x64x128xf32>
    %123 = vector.shape_cast %122 : vector<1x1x64x128xf32> to vector<64x128xf32>
    %124 = vector.shape_cast %121 : vector<64x128xf32> to vector<1x1x64x128xf32>
    tpu.vector_store %arg8[%c0_156, %c0_157, %c0_158, %c0_159], %124 {strides = array<i32>} : memref<1x1x64x128xf32, #tpu.memory_space<vmem>>, vector<1x1x64x128xf32>,
    return
  }
  func.func @transform_0(%arg0: i32, %arg1: i32) -> (i32, i32, i32, i32, i32) {
    %c0_i32 = arith.constant 0 : i32
    %c0_i32_0 = arith.constant 0 : i32
    %c0_i32_1 = arith.constant 0 : i32
    %c0_i32_2 = arith.constant 0 : i32
    return %arg0, %c0_i32, %arg1, %c0_i32_0, %c0_i32_1 : i32, i32, i32, i32, i32
  }
  func.func @transform_1(%arg0: i32, %arg1: i32) -> (i32, i32, i32, i32, i32) {
    %c1_i32 = arith.constant 1 : i32
    %0 = arith.addi %arg1, %c1_i32 : i32
    %c8_i32 = arith.constant 8 : i32
    %1 = arith.muli %0, %c8_i32 : i32
    %c0_i32 = arith.constant 0 : i32
    %c0_i32_0 = arith.constant 0 : i32
    %c0_i32_1 = arith.constant 0 : i32
    %c0_i32_2 = arith.constant 0 : i32
    return %arg0, %c0_i32, %1, %c0_i32_0, %c0_i32_1 : i32, i32, i32, i32, i32
  }
  func.func @transform_2(%arg0: i32, %arg1: i32) -> (i32, i32) {
    %c0_i32 = arith.constant 0 : i32
    %c0_i32_0 = arith.constant 0 : i32
    %c0_i32_1 = arith.constant 0 : i32
    return %c0_i32, %c0_i32_0 : i32, i32
  }
  func.func @transform_3(%arg0: i32, %arg1: i32) -> (i32, i32) {
    %c0_i32 = arith.constant 0 : i32
    %c0_i32_0 = arith.constant 0 : i32
    %c0_i32_1 = arith.constant 0 : i32
    return %c0_i32, %c0_i32_0 : i32, i32
  }
  func.func @transform_4(%arg0: i32, %arg1: i32) -> (i32, i32) {
    %c0_i32 = arith.constant 0 : i32
    %c0_i32_0 = arith.constant 0 : i32
    %c0_i32_1 = arith.constant 0 : i32
    return %c0_i32, %c0_i32_0 : i32, i32
  }
  func.func @transform_5(%arg0: i32, %arg1: i32) -> (i32, i32) {
    %c0_i32 = arith.constant 0 : i32
    %c0_i32_0 = arith.constant 0 : i32
    %c0_i32_1 = arith.constant 0 : i32
    return %c0_i32, %c0_i32_0 : i32, i32
  }
  func.func @transform_6(%arg0: i32, %arg1: i32) -> (i32, i32, i32, i32) {
    %c0_i32 = arith.constant 0 : i32
    %c0_i32_0 = arith.constant 0 : i32
    %c0_i32_1 = arith.constant 0 : i32
    return %arg0, %arg1, %c0_i32, %c0_i32_0 : i32, i32, i32, i32
  }
}

</mosaic_0001>

<bundles_post_ra>
// kernel: tpu_custom_call.1
= control target key start
LH: loop header
LB: loop body
LE: loop exit
PB: predicated region body
PF: predicated region fallthrough
CT: control target
= control target key end

     0   :  { %s2150_s0 = inlined_call_operand.hbm [shape: f32[2,4,16,16,128], index: 0, kind: input, shape index: {}]   ;;  %s2151_s1 = inlined_call_operand.hbm [shape: f32[2,4,16,16,128], index: 1, kind: input, shape index: {}]   ;;  %s2152_s2 = inlined_call_operand.hbm [shape: f32[9,128], index: 2, kind: input, shape index: {}]   ;;  %s2153_s3 = inlined_call_operand.vmem [shape: f32[1,128], index: 3, kind: input, shape index: {}]   ;;  %s2154_s4 = inlined_call_operand.hbm [shape: f32[128,128], index: 4, kind: input, shape index: {}]   ;;  %s2155_s5 = inlined_call_operand.vmem [shape: f32[1,128], index: 5, kind: input, shape index: {}]   ;;  %s2156_s6 = inlined_call_operand.hbm [shape: f32[2,1,64,128], index: 6, kind: output, shape index: {}]  }
   0x1   :  { %2165 = sst [smem:[#allocation27_spill]] %s2150_s0 }
   0x2   :  { %11 = vsyncpa [#allocation4], 0 }
   0x3   :  { %13 = vsyncpa [#allocation4 + $0x1], 0 }
   0x4   :  { %14 = vsyncpa [#allocation7], 0 }
   0x5   :  { %16 = vsyncpa [#allocation7 + $0x1], 0 }
   0x6   :  { %17 = vsyncpa [#allocation10], 0 }
   0x7   :  { %18 = vsyncpa [#allocation5], 0 }
   0x8   :  { %20 = vsyncpa [#allocation5 + $0x1], 0  ;;  %s1692_s21 = smov 0   ;;  %s1694_s22 = smov 0  }
   0x9   :  { %s1696_s23 = smov 0   ;;  %s1698_s24 = smov 0  }
   0xa   :  { %s1700_s25 = smov 0   ;;  %s1702_s26 = smov 0  }
   0xb LB: > { %2166 = sst [smem:[#allocation23_spill]] %s1616_s21  ;;  %s1723_s27 = sadd.s32 4294967295, %s1636_s26   ;;  %s1636_s26 = sphi %s1702_s26, %s26_s26   ;;  %s1632_s25 = sphi %s1700_s25, %s2194_s25   ;;  %s1628_s24 = sphi %s1698_s24, %s2193_s24   ;;  %s1624_s23 = sphi %s1696_s23, %s2192_s23   ;;  %s1620_s22 = sphi %s1694_s22, %s2191_s22   ;;  %s1616_s21 = sphi %s1692_s21, %s2190_s21  }
   0xc   : > { %s1166_s28 = sadd.s32 4294967294, %s1636_s26   ;;  %s38_s29 = sadd.s32 1, %s1632_s25 }
   0xd   : > { %s47_s30 = sadd.s32 1, %s1624_s23  ;;  %p40_p0 = scmp.ge.s32.totalorder %s38_s29, 2 }
   0xe   : > { %p54_p1 = scmp.ne.s32.totalorder %s1624_s23, %s1620_s22  ;;  %p55_p2 = scmp.eq.s32.totalorder %s1636_s26, 0 }
   0xf   : > { %p60_p3 = scmp.ne.s32.totalorder %s1620_s22, %s1616_s21  ;;  %s2196_s29 = smov (%p40_p0, %s38_s29), 0 }
  0x10   : > { %2167 = sst [smem:[#allocation24_spill]] %s2196_s29  ;;  %p1735_p4 = por %p55_p2, %p54_p1 }
  0x11   : > { %p2158_p5 = scmp.eq.s32.totalorder %s1723_s27, 0  ;;  %s42_s8 = ssub.s32 %s1632_s25, %s2196_s29 }
  0x12   : > { %s2168_s7 = scalar_select %p1735_p4, 1, 0 }
  0x13   : > { %p202_p6 = scmp.eq.s32.totalorder %s1723_s27, 1  ;;  %p45_p7 = scmp.eq.s32.totalorder %s42_s8, 0 }
  0x14   : > { %p1745_p8 = por %p2158_p5, %p60_p3  ;;  %p208_p10 = scmp.eq.s32.totalorder %s1166_s28, 1 }
  0x15   : > { %p1749_p9 = por %p202_p6, %p54_p1  ;;  %p1167_p12 = scmp.ge.s32.totalorder %s1636_s26, 1 }
  0x16   : > { %s2169_s9 = scalar_select %p1745_p8, 1, 0 }
  0x17   : > { %s2170_s10 = scalar_select %p1749_p9, 1, 0 }
  0x18   : > { %s1754_s11 = scalar_select %p45_p7, %s1624_s23, %s47_s30  }
  0x19   : > { %p1756_p11 = por %p208_p10, %p60_p3  ;;  %p215_p13 = scmp.lt.s32.totalorder %s1636_s26, 3 }
  0x1a   : > { %2171 = sst [smem:[#allocation25_spill]] %s1754_s11  ;;  %s1638_s14 = smov [#allocation8]  }
  0x1b   : > { %s2172_s12 = scalar_select %p1756_p11, 1, 0 }
  0x1c   : > { %p1762_p0 = pnand %p1167_p12, %p215_p13  ;;  %s227_s15 = sshll.u32 %s1638_s14, 4  ;;  %s228_s15 = int_to_ptr.vmem [resolvable:$true] %s227_s15 }
  0x1d   : > { %2173 = sst [smem:[#allocation26_spill]] %s2172_s12  ;;  %s1639_s16 = smov [#allocation9]  }
  0x1e   : > { %s2174_s13 = scalar_select %p1762_p0, 1, 0 }
  0x1f   : > { %p1404_p1 = pneg %p1762_p0  ;;  %s243_s17 = sshll.u32 %s1639_s16, 4  ;;  %s1774_s17 = int_to_ptr.vmem [resolvable:$true] %s243_s17 }
  0x20   : > { %s1486_s28 = scalar_lea.hbm %s2152_s2, 256 }
  0x21   : > { %p1770_p2 = pnand %p1404_p1, %p2158_p5  ;;  %p1487_p3 = scmp.ne.s32.totalorder %s2152_s2, %s1486_s28 }
  0x22   : > { %p1493_p12 = scmp.lt.u32.totalorder %s1486_s28, %s2152_s2 }
  0x23   : > { %p1488_p6 = pneg %p1770_p2 }
  0x25   : > { %p1489_p7 = pnand %p1488_p6, %p1487_p3 }
  0x27   : > { %p1490_p10 = pneg %p1489_p7 }
  0x29   : > { %p1495_p13 = pnand %p1493_p12, %p1490_p10 }
  0x2b   : > { %1498 = shalt.err (!%p1495_p13)
}
  0x2c   : > { %s1499_s29 = scalar_lea.vmem %s228_s15, 256  ;;  %p1507_p9 = scmp.lt.s32.totalorder %s228_s15, %s228_s15 }
  0x2d   : > { %p1500_p1 = scmp.ne.s32.totalorder %s228_s15, %s1499_s29  ;;  %p1508_p8 = scmp.lt.s32.totalorder %s1499_s29, %s1499_s29 }
  0x2f   : > { %p1502_p5 = pnand %p1500_p1, %p1488_p6  ;;  %p1509_p0 = por %p1508_p8, %p1507_p9 }
  0x31   : > { %p1503_p11 = pneg %p1502_p5 }
  0x33   : > { %p1510_p4 = pnand %p1509_p0, %p1503_p11 }
  0x35   : > { %1513 = shalt.err (!%p1510_p4)
}
  0x36   : > { %s1640_s19 = smov 128   ;;  %s1641_s20 = smov 8  }
  0x37   : > { %1407 = dma.hbm_to_vmem [thread:$0]  (!%p1770_p2), %s2152_s2, 256, %s228_s15, [#allocation7], %s1640_s19, %s1640_s19, %s1641_s20  }
  0x38   : > { %s1514_s16 = scalar_lea.hbm %s2154_s4, 2048 }
  0x39   : > { %p1515_p5 = scmp.ne.s32.totalorder %s2154_s4, %s1514_s16  ;;  %p1521_p9 = scmp.lt.u32.totalorder %s1514_s16, %s2154_s4 }
  0x3b   : > { %p1517_p4 = pnand %p1515_p5, %p1488_p6 }
  0x3d   : > { %p1518_p8 = pneg %p1517_p4 }
  0x3f   : > { %p1523_p11 = pnand %p1521_p9, %p1518_p8 }
  0x41   : > { %1526 = shalt.err (!%p1523_p11)
}
  0x42   : > { %s1527_s15 = scalar_lea.vmem %s1774_s17, 2048  ;;  %p1535_p10 = scmp.lt.s32.totalorder %s1774_s17, %s1774_s17 }
  0x43   : > { %p1528_p0 = scmp.ne.s32.totalorder %s1774_s17, %s1527_s15  ;;  %p1536_p12 = scmp.lt.s32.totalorder %s1527_s15, %s1527_s15 }
  0x45   : > { %p1530_p3 = pnand %p1528_p0, %p1488_p6  ;;  %p1537_p13 = por %p1536_p12, %p1535_p10 }
  0x47   : > { %p1531_p7 = pneg %p1530_p3 }
  0x49   : > { %p1538_p1 = pnand %p1537_p13, %p1531_p7 }
  0x4b   : > { %1541 = shalt.err (!%p1538_p1)
}
  0x4c   : > { %1410 = dma.hbm_to_vmem [thread:$0]  (!%p1770_p2), %s2154_s4, 2048, %s1774_s17, [#allocation10], %s1640_s19, %s1640_s19, %s1641_s20  }
  0x4d   : > { %p1170_p5 = scmp.ge.s32.totalorder %s1636_s26, 2 }
  0x4f   : > { %256 = sbr.rel (%p1170_p5) target bundleno = 115 (0x73), region = 32 }
  0x56   : > { %s1827_s12 = sand.u32 1, %s1624_s23   ;;  %s1257_s18 = sshll.u32 %s1632_s25, 14 }
  0x57   : > { %s1171_s28 = sshll.u32 %s1827_s12, 9  ;;  %s2176_s0 = sld [smem:[#allocation27_spill]] }
  0x58   : > { %p2177_p2 = scmp.ne.s32.totalorder %s2168_s7, 0  ;;  %s264_s8 = scalar_lea.vmem [#allocation3], %s1171_s28 }
  0x59   : > { %s286_s14 = sshll.u32 %s264_s8, 4  ;;  %s1642_s29 = smov 4096   ;;  %s287_s14 = int_to_ptr.vmem [resolvable:$true] %s286_s14 }
  0x5a   : > { %s1380_s20 = scalar_select %p2177_p2, [#allocation0], [#allocation16] }
  0x5b   : > { %1381 = sst [smem:[#allocation13]] (%p2177_p2), %s1642_s29  ;;  %s1643_s15 = smov 2048  }
  0x5c   : > { %s278_s16 = sld [smem:[%s1380_s20]]   ;;  %s1644_s21 = smov 16  }
  0x5d   : > { %s273_s19 = scalar_lea.hbm %s2176_s0, %s1257_s18  ;;  %1382 = sst [smem:[#allocation13 + $0x1]] (%p2177_p2), %s1643_s15 }
  0x5e   : > { %1383 = sst [smem:[#allocation13 + $0x2]] (%p2177_p2), %s1644_s21  ;;  %s1645_s11 = smov 128  }
  0x5f   : > { %1384 = sst [smem:[#allocation13 + $0x3]] (%p2177_p2), %s1645_s11  ;;  %s1646_s30 = smov 8  }
  0x60   : > { %1385 = sst [smem:[#allocation13 + $0x4]] (%p2177_p2), %s1645_s11  ;;  %s261_s20 = scalar_lea.sflag [#allocation4], %s1827_s12 }
  0x61   : > { %1386 = sst [smem:[#allocation13 + $0x5]] (%p2177_p2), %s1646_s30  ;;  %s1647_s8 = smov [#allocation12]  }
  0x62   : > { %s1174_s28 = sshll.u32 %s278_s16, 26 }
  0x63   : > { %s1175_s17 = sadd.s32 134217728, %s1174_s28 }
  0x64   : > { %1387 = dma.general (%p2177_p2), %s273_s19, 8192, %s287_s14, %s261_s20, %s1647_s8, [#allocation13], %s1175_s17, 0  }
  0x65   : > { %s309_s29 = sand.u32 1, %s1636_s26   ;;  %s1176_s15 = sshll.u32 %s1827_s12, 6 }
  0x66   : > { %s1078_s16 = scalar_lea.hbm %s2151_s1, %s1257_s18  ;;  %s313_s28 = scalar_lea.vmem [#allocation6], %s1176_s15 }
  0x67   : > { %s1079_s30 = scalar_lea.hbm %s1078_s16, 2048  ;;  %s336_s0 = sshll.u32 %s313_s28, 4  ;;  %s337_s0 = int_to_ptr.vmem [resolvable:$true] %s336_s0 }
  0x68   : > { %s1388_s19 = scalar_select %p2177_p2, [#allocation0], [#allocation17] }
  0x69   : > { %s1648_s17 = smov 4096   ;;  %s1649_s20 = smov 256  }
  0x6a   : > { %s328_s14 = sld [smem:[%s1388_s19]]   ;;  %s1650_s12 = smov 2  }
  0x6b   : > { %1389 = sst [smem:[#allocation15]] (%p2177_p2), %s1648_s17  ;;  %s1651_s8 = smov 128  }
  0x6c   : > { %1390 = sst [smem:[#allocation15 + $0x1]] (%p2177_p2), %s1649_s20  ;;  %s1652_s18 = smov 8  }
  0x6d   : > { %1391 = sst [smem:[#allocation15 + $0x2]] (%p2177_p2), %s1650_s12  ;;  %s310_s11 = scalar_lea.sflag [#allocation7], %s309_s29 }
  0x6e   : > { %1392 = sst [smem:[#allocation15 + $0x3]] (%p2177_p2), %s1651_s8  ;;  %s1653_s16 = smov [#allocation14]  }
  0x6f   : > { %1393 = sst [smem:[#allocation15 + $0x4]] (%p2177_p2), %s1651_s8 }
  0x70   : > { %1394 = sst [smem:[#allocation15 + $0x5]] (%p2177_p2), %s1652_s18  ;;  %s1179_s15 = sshll.u32 %s328_s14, 26 }
  0x71   : > { %s1180_s21 = sadd.s32 134217728, %s1179_s15 }
  0x72   : > { %1395 = dma.general (%p2177_p2), %s1079_s30, 1024, %s337_s0, %s310_s11, %s1653_s16, [#allocation15], %s1180_s21, 0  }
  0x73 PF: > { %p2178_p6 = scmp.ne.s32.totalorder %s2174_s13, 0 }
  0x74   : > { %s1875_s28 = sand.u32 (!%p2178_p6), 1, %s1620_s22   ;;  %p2179_p4 = scmp.ne.s32.totalorder (!%p2178_p6), %s2169_s9, 0 }
  0x75   : > { %361 = sbr.rel (%p2178_p6) target bundleno = 428 (0x1ac), region = 44  ;;  %s1182_s19 = sshll.u32 (!%p2178_p6), %s1875_s28, 9 }
  0x76   : > { %s364_s17 = scalar_lea.sflag (!%p2178_p6), [#allocation4], %s1875_s28  ;;  %s1879_s20 = scalar_lea.vmem (!%p2178_p6), [#allocation3], %s1182_s19 }
  0x7c   : > { %1595 = dma.done.wait (%p2179_p4), %s364_s17, 8192  }
  0x7d   : > { %1597 = vsyncadd (%p2179_p4), %s364_s17, 4294959104  ;;  %s372_s0 = sand.u32 1, %s1723_s27   ;;  %s1183_s7 = sshll.u32 %s1875_s28, 6 }
  0x7e   : > { %s373_s13 = scalar_lea.sflag [#allocation7], %s372_s0  ;;  %s1889_s29 = scalar_lea.vmem [#allocation6], %s1183_s7 }
  0x7f   : > { %1599 = dma.done.wait (%p2179_p4), %s373_s13, 1024  }
  0x80   : > { %1601 = vsyncadd (%p2179_p4), %s373_s13, 4294966272  ;;  %p2180_p8 = scmp.eq.s32.totalorder %s1723_s27, 0 }
  0x82   : > { %1603 = dma.done.wait (%p2180_p8), [#allocation7], 256   ;;  %p2181_p9 = pmov %p2180_p8 }
  0x83   : > { %p2182_p11 = pmov %p2180_p8 }
  0x84   : > { %1605 = vsyncadd (%p2181_p9), [#allocation7], 4294967040 }
  0x85   : > { %1607 = dma.done.wait (%p2182_p11), [#allocation10], 2048   ;;  %p2183_p0 = pmov %p2180_p8 }
  0x86   : > { %v872_v0 = vld [vmem:[#allocation9] sm:$0xff]  ;;  %v873_v1 = vld [vmem:[#allocation9 + $0x8] sm:$0xff]  ;;  %v874_v2 = vld [vmem:[#allocation9 + $0x10] sm:$0xff]  ;;  %s417_s12 = scalar_lea.vmem [#allocation11], %s1183_s7  ;;  %s1259_s18 = sshll.u32 %s1628_s24, 10 }
  0x87   : > { %1609 = vsyncadd (%p2183_p0), [#allocation10], 4294965248  ;;  %v1328_v3 = vpack.c.bf16 %v873_v1, %v872_v0  ;;  %v875_v4 = vld [vmem:[#allocation9 + $0x18] sm:$0xff]  ;;  %v876_v6 = vld [vmem:[#allocation9 + $0x20] sm:$0xff]  ;;  %s1032_s8 = sshll.u32 %s417_s12, 4  ;;  %s2101_s11 = scalar_lea.hbm %s2156_s6, %s1259_s18  ;;  %s2096_s8 = int_to_ptr.vmem [resolvable:$true] %s1032_s8 }
  0x88   : > { %v1332_v5 = vpack.c.bf16 %v875_v4, %v874_v2  ;;  %v877_v7 = vld [vmem:[#allocation9 + $0x28] sm:$0xff]  ;;  %v878_v8 = vld [vmem:[#allocation9 + $0x30] sm:$0xff]  ;;  %v879_v9 = vld [vmem:[#allocation9 + $0x38] sm:$0xff]  ;;  %s1017_s16 = scalar_lea.sflag [#allocation5], %s1875_s28  ;;  %s1542_s24 = scalar_lea.vmem %s2096_s8, 1024 }
  0x89   : > { %1329 = vmatprep.subr.bf16.mxu0 %v1328_v3  ;;  %1360 = vmatprep.subr.bf16.mxu1 %v1328_v3  ;;  %v1336_v10 = vpack.c.bf16 %v877_v7, %v876_v6  ;;  %v880_v11 = vld [vmem:[#allocation9 + $0x40] sm:$0xff]  ;;  %v881_v12 = vld [vmem:[#allocation9 + $0x48] sm:$0xff]  ;;  %v882_v13 = vld [vmem:[#allocation9 + $0x50] sm:$0xff]  ;;  %v1340_v33 = vpack.c.bf16 %v879_v9, %v878_v8  ;;  %p1543_p3 = scmp.ne.s32.totalorder %s2096_s8, %s1542_s24  ;;  %p2184_p7 = scmp.ne.s32.totalorder %s2170_s10, 0 }
  0x8a   : > { %1331 = vmatpush3.bf16.msra.mxu0 %v1328_v3  ;;  %1368 = vmatpush3.bf16.msra.mxu1 %v1328_v3  ;;  %v883_v14 = vld [vmem:[#allocation9 + $0x58] sm:$0xff]  ;;  %v884_v15 = vld [vmem:[#allocation9 + $0x60] sm:$0xff]  ;;  %v885_v16 = vld [vmem:[#allocation9 + $0x68] sm:$0xff]  ;;  %v1344_v39 = vpack.c.bf16 %v881_v12, %v880_v11  ;;  %s1654_s19 = smov [#allocation11]  }
  0x8b   : > { %1333 = vmatprep.subr.bf16.mxu0 %v1332_v5  ;;  %1361 = vmatprep.subr.bf16.mxu1 %v1332_v5  ;;  %v886_v17 = vld [vmem:[#allocation9 + $0x70] sm:$0xff]  ;;  %v887_v18 = vld [vmem:[#allocation9 + $0x78] sm:$0xff]  ;;  %v1225_v38 = vld [vmem:[%s1879_s20 + $0x10] sm:$0xff]  ;;  %v1928_v40 = vpack.c.bf16 %v883_v14, %v882_v13  ;;  %v1930_v41 = vpack.c.bf16 %v885_v16, %v884_v15  ;;  %p1544_p10 = pnand %p1543_p3, %p2184_p7  ;;  %s1546_s17 = sshll.u32 %s1654_s19, 4  ;;  %s1547_s17 = int_to_ptr.vmem [resolvable:$false] %s1546_s17 }
  0x8c   : > { %v1903_v19 = vld [vmem:[#allocation8] ss:$0 sm:$0xff]  ;;  %v1907_v22 = vld [vmem:[#allocation8 + $0x1] ss:$0 sm:$0xff]  ;;  %v1910_v24 = vld [vmem:[#allocation8 + $0x2] ss:$0 sm:$0xff]  ;;  %v1932_v42 = vpack.c.bf16 %v887_v18, %v886_v17  ;;  %p1549_p13 = scmp.lt.s32.totalorder %s2096_s8, %s1547_s17 }
  0x8d   : > { %v430_v20 = vld [vmem:[%s1879_s20] sm:$0xff]  ;;  %v1233_v44 = vld [vmem:[%s1879_s20 + $0x90] sm:$0xff]  ;;  %v1940_v49 = vld [vmem:[#allocation8 + $0x8] ss:$0 sm:$0xff]  ;;  %v451_v56 = vmul.f32 %v1225_v38, %v1903_v19  ;;  %p1545_p12 = pneg %p1544_p10 }
  0x8e   : > { %v450_v21 = vmul.f32 %v1903_v19, %v430_v20  ;;  %v1188_v23 = vld [vmem:[%s1879_s20 + $0x80] sm:$0xff]  ;;  %1335 = vmatpush3.bf16.msra.mxu0 %v1332_v5  ;;  %1369 = vmatpush3.bf16.msra.mxu1 %v1332_v5  ;;  %v1242_v50 = vld [vmem:[%s1879_s20 + $0x11] sm:$0xff]  ;;  %v497_v57 = vmul.f32 %v1233_v44, %v1907_v22 }
  0x8f   : > { %v496_v25 = vmul.f32 %v1907_v22, %v1188_v23  ;;  %v521_v26 = vld [vmem:[%s1879_s20 + $0x1] sm:$0xff]  ;;  %1337 = vmatprep.subr.bf16.mxu0 %v1336_v10  ;;  %1362 = vmatprep.subr.bf16.mxu1 %v1336_v10  ;;  %v816_v0 = vmul.f32 %v1940_v49, %v1242_v50  ;;  %v542_v2 = vmul.f32 %v1242_v50, %v1910_v24  ;;  %v1199_v3 = vld [vmem:[%s1879_s20 + $0x110] sm:$0xff] }
  0x90   : > { %v1914_v27 = vld [vmem:[#allocation8 + $0x3] ss:$0 sm:$0xff]  ;;  %v541_v29 = vmul.f32 %v1910_v24, %v521_v26  ;;  %v1918_v30 = vld [vmem:[#allocation8 + $0x4] ss:$0 sm:$0xff]  ;;  %v1921_v32 = vld [vmem:[#allocation8 + $0x5] ss:$0 sm:$0xff]  ;;  %v505_v13 = vadd.f32 %v497_v57, %v451_v56 }
  0x91   : > { %v1198_v28 = vld [vmem:[%s1879_s20 + $0x100] sm:$0xff]  ;;  %v504_v34 = vadd.f32 %v496_v25, %v450_v21  ;;  %v1229_v8 = vld [vmem:[%s1879_s20 + $0x50] sm:$0xff]  ;;  %v588_v14 = vmul.f32 %v1914_v27, %v1199_v3 }
  0x92   : > { %v1207_v31 = vld [vmem:[%s1879_s20 + $0x180] sm:$0xff]  ;;  %v587_v35 = vmul.f32 %v1914_v27, %v1198_v28  ;;  %1339 = vmatpush3.bf16.msra.mxu0 %v1336_v10  ;;  %1370 = vmatpush3.bf16.msra.mxu1 %v1336_v10  ;;  %v1208_v9 = vld [vmem:[%s1879_s20 + $0x190] sm:$0xff]  ;;  %v550_v23 = vadd.f32 %v542_v2, %v505_v13 }
  0x93   : > { %v1216_v36 = vld [vmem:[%s1879_s20 + $0x101] sm:$0xff]  ;;  %v549_v45 = vadd.f32 %v541_v29, %v504_v34  ;;  %v633_v46 = vmul.f32 %v1918_v30, %v1207_v31  ;;  %1341 = vmatprep.subr.bf16.mxu0 %v1340_v33  ;;  %1363 = vmatprep.subr.bf16.mxu1 %v1340_v33  ;;  %v1217_v10 = vld [vmem:[%s1879_s20 + $0x111] sm:$0xff]  ;;  %v634_v25 = vmul.f32 %v1918_v30, %v1208_v9 }
  0x94   : > { %v1925_v37 = vld [vmem:[#allocation8 + $0x6] ss:$0 sm:$0xff]  ;;  %v1934_v43 = vld [vmem:[#allocation8 + $0x7] ss:$0 sm:$0xff]  ;;  %v678_v47 = vmul.f32 %v1921_v32, %v1216_v36  ;;  %v1237_v12 = vld [vmem:[%s1879_s20 + $0xd0] sm:$0xff]  ;;  %v679_v26 = vmul.f32 %v1921_v32, %v1217_v10  ;;  %v455_v31 = vmul.f32 %v1229_v8, %v1903_v19  ;;  %v596_v34 = vadd.f32 %v588_v14, %v550_v23 }
  0x95   : > { %v723_v48 = vmul.f32 %v1925_v37, %v1225_v38  ;;  %v1944_v51 = vld [vmem:[%s1879_s20 + $0x40] sm:$0xff]  ;;  %v595_v58 = vadd.f32 %v587_v35, %v549_v45  ;;  %v771_v63 = vmul.f32 %v1934_v43, %v1233_v44  ;;  %v727_v11 = vmul.f32 %v1925_v37, %v1229_v8  ;;  %v1246_v18 = vld [vmem:[%s1879_s20 + $0x51] sm:$0xff] }
  0x96   : > { %v454_v52 = vmul.f32 %v1903_v19, %v1944_v51  ;;  %v1949_v53 = vld [vmem:[%s1879_s20 + $0xc0] sm:$0xff]  ;;  %1343 = vmatpush3.bf16.msra.mxu0 %v1340_v33  ;;  %1371 = vmatpush3.bf16.msra.mxu1 %v1340_v33  ;;  %v775_v17 = vmul.f32 %v1934_v43, %v1237_v12  ;;  %v1203_v20 = vld [vmem:[%s1879_s20 + $0x150] sm:$0xff]  ;;  %v1980_v21 = vmul.f32 %v1940_v49, %v1246_v18 }
  0x97   : > { %v1952_v54 = vld [vmem:[%s1879_s20 + $0x41] sm:$0xff]  ;;  %v500_v59 = vmul.f32 %v1907_v22, %v1949_v53  ;;  %v641_v4 = vadd.f32 %v633_v46, %v595_v58  ;;  %1345 = vmatprep.subr.bf16.mxu0 %v1344_v39  ;;  %1364 = vmatprep.subr.bf16.mxu1 %v1344_v39  ;;  %v501_v33 = vmul.f32 %v1237_v12, %v1907_v22  ;;  %v1212_v44 = vld [vmem:[%s1879_s20 + $0x1d0] sm:$0xff] }
  0x98   : > { %v1202_v55 = vld [vmem:[%s1879_s20 + $0x140] sm:$0xff]  ;;  %v545_v60 = vmul.f32 %v1910_v24, %v1952_v54  ;;  %v546_v36 = vmul.f32 %v1246_v18, %v1910_v24  ;;  %v592_v38 = vmul.f32 %v1914_v27, %v1203_v20 }
  0x99   : > { %v1211_v61 = vld [vmem:[%s1879_s20 + $0x1c0] sm:$0xff]  ;;  %v591_v1 = vmul.f32 %v1914_v27, %v1202_v55  ;;  %v508_v5 = vadd.f32 %v500_v59, %v454_v52  ;;  %v686_v15 = vadd.f32 %v678_v47, %v641_v4  ;;  %v509_v50 = vadd.f32 %v501_v33, %v455_v31  ;;  %v1221_v52 = vld [vmem:[%s1879_s20 + $0x151] sm:$0xff] }
  0x9a   : > { %v1220_v62 = vld [vmem:[%s1879_s20 + $0x141] sm:$0xff]  ;;  %v637_v6 = vmul.f32 %v1918_v30, %v1211_v61  ;;  %1347 = vmatpush3.bf16.msra.mxu0 %v1344_v39  ;;  %1372 = vmatpush3.bf16.msra.mxu1 %v1344_v39  ;;  %v1998_v39 = vld [vmem:[%s2153_s3] ss:$0 sm:$0xff]  ;;  %v642_v55 = vadd.f32 %v634_v25, %v596_v34 }
  0x9b   : > { %v682_v7 = vmul.f32 %v1921_v32, %v1220_v62  ;;  %v553_v16 = vadd.f32 %v545_v60, %v508_v5  ;;  %v730_v28 = vadd.f32 %v723_v48, %v686_v15  ;;  %v1226_v35 = vld [vmem:[%s1879_s20 + $0x20] sm:$0xff]  ;;  %1349 = vmatprep.subr.bf16.mxu0 %v1928_v40  ;;  %1365 = vmatprep.subr.bf16.mxu1 %v1928_v40 }
  0x9c   : > { %v1234_v47 = vld [vmem:[%s1879_s20 + $0xa0] sm:$0xff]  ;;  %v724_v56 = vmul.f32 %v1925_v37, %v1226_v35  ;;  %v554_v61 = vadd.f32 %v546_v36, %v509_v50  ;;  %v638_v62 = vmul.f32 %v1918_v30, %v1212_v44  ;;  %v452_v2 = vmul.f32 %v1226_v35, %v1903_v19 }
  0x9d   : > { %v599_v29 = vadd.f32 %v591_v1, %v553_v16  ;;  %v778_v45 = vadd.f32 %v771_v63, %v730_v28  ;;  %v1243_v48 = vld [vmem:[%s1879_s20 + $0x21] sm:$0xff]  ;;  %v772_v57 = vmul.f32 %v1934_v43, %v1234_v47  ;;  %v687_v63 = vadd.f32 %v679_v26, %v642_v55  ;;  %v1235_v55 = vld [vmem:[%s1879_s20 + $0xb0] sm:$0xff] }
  0x9e   : > { %v817_v58 = vmul.f32 %v1940_v49, %v1243_v48  ;;  %1351 = vmatpush3.bf16.msra.mxu0 %v1928_v40  ;;  %1373 = vmatpush3.bf16.msra.mxu1 %v1928_v40  ;;  %v683_v1 = vmul.f32 %v1921_v32, %v1221_v52  ;;  %v600_v4 = vadd.f32 %v592_v38, %v554_v61  ;;  %v1230_v5 = vld [vmem:[%s1879_s20 + $0x60] sm:$0xff]  ;;  %v1227_v52 = vld [vmem:[%s1879_s20 + $0x30] sm:$0xff] }
  0x9f   : > { %v645_v46 = vadd.f32 %v637_v6, %v599_v29  ;;  %v823_v59 = vadd.f32 %v816_v0, %v778_v45  ;;  %1353 = vmatprep.subr.bf16.mxu0 %v1930_v41  ;;  %1366 = vmatprep.subr.bf16.mxu1 %v1930_v41  ;;  %v1200_v6 = vld [vmem:[%s1879_s20 + $0x120] sm:$0xff]  ;;  %v728_v40 = vmul.f32 %v1925_v37, %v1230_v5 }
  0xa0   : > { %v1238_v8 = vld [vmem:[%s1879_s20 + $0xe0] sm:$0xff]  ;;  %v498_v9 = vmul.f32 %v1234_v47, %v1907_v22  ;;  %v543_v10 = vmul.f32 %v1243_v48, %v1910_v24  ;;  %v646_v14 = vadd.f32 %v638_v62, %v600_v4  ;;  %v589_v25 = vmul.f32 %v1914_v27, %v1200_v6 }
  0xa1   : > { %v690_v60 = vadd.f32 %v682_v7, %v645_v46  ;;  %v856_v0 = vadd.f32 %v1998_v39, %v823_v59  ;;  %v731_v7 = vadd.f32 %v724_v56, %v687_v63  ;;  %v776_v15 = vmul.f32 %v1934_v43, %v1238_v8  ;;  %v1209_v16 = vld [vmem:[%s1879_s20 + $0x1a0] sm:$0xff] }
  0xa2   : > { %v1218_v18 = vld [vmem:[%s1879_s20 + $0x121] sm:$0xff]  ;;  %1355 = vmatpush3.bf16.msra.mxu0 %v1930_v41  ;;  %1374 = vmatpush3.bf16.msra.mxu1 %v1930_v41  ;;  %v506_v23 = vadd.f32 %v498_v9, %v452_v2  ;;  %v691_v26 = vadd.f32 %v683_v1, %v646_v14  ;;  %v635_v41 = vmul.f32 %v1918_v30, %v1209_v16  ;;  %v1201_v2 = vld [vmem:[%s1879_s20 + $0x130] sm:$0xff] }
  0xa3   : > { %v734_v3 = vadd.f32 %v727_v11, %v690_v60  ;;  %v864_v12 = vmax.f32 %v856_v0, 0.0  ;;  %v779_v11 = vadd.f32 %v772_v57, %v731_v7  ;;  %v1247_v20 = vld [vmem:[%s1879_s20 + $0x61] sm:$0xff]  ;;  %1357 = vmatprep.subr.bf16.mxu0 %v1932_v42  ;;  %1367 = vmatprep.subr.bf16.mxu1 %v1932_v42  ;;  %v680_v33 = vmul.f32 %v1921_v32, %v1218_v18  ;;  %v1239_v14 = vld [vmem:[%s1879_s20 + $0xf0] sm:$0xff] }
  0xa4   : > { %v821_v28 = vmul.f32 %v1940_v49, %v1247_v20  ;;  %v551_v31 = vadd.f32 %v543_v10, %v506_v23  ;;  %v1204_v34 = vld [vmem:[%s1879_s20 + $0x160] sm:$0xff]  ;;  %v735_v36 = vadd.f32 %v728_v40, %v691_v26  ;;  %v456_v38 = vmul.f32 %v1230_v5, %v1903_v19  ;;  %v1210_v10 = vld [vmem:[%s1879_s20 + $0x1b0] sm:$0xff] }
  0xa5   : > { %v782_v13 = vadd.f32 %v775_v17, %v734_v3  ;;  %1316 = vmatprep.mubr.f32.mxu0 %v864_v12  ;;  %v824_v29 = vadd.f32 %v817_v58, %v779_v11  ;;  %v547_v46 = vmul.f32 %v1247_v20, %v1910_v24  ;;  %v1213_v47 = vld [vmem:[%s1879_s20 + $0x1e0] sm:$0xff]  ;;  %v593_v57 = vmul.f32 %v1914_v27, %v1204_v34 }
  0xa6   : > { %1359 = vmatpush3.bf16.msra.mxu0 %v1932_v42  ;;  %1375 = vmatpush3.bf16.msra.mxu1 %v1932_v42  ;;  %v597_v45 = vadd.f32 %v589_v25, %v551_v31  ;;  %v783_v50 = vadd.f32 %v776_v15, %v735_v36  ;;  %v725_v60 = vmul.f32 %v1925_v37, %v1227_v52  ;;  %v1244_v42 = vld [vmem:[%s1879_s20 + $0x31] sm:$0xff]  ;;  %v1222_v61 = vld [vmem:[%s1879_s20 + $0x161] sm:$0xff] }
  0xa7   : > { %v827_v17 = vadd.f32 %v1980_v21, %v782_v13  ;;  %v502_v21 = vmul.f32 %v1238_v8, %v1907_v22  ;;  %v857_v44 = vadd.f32 %v1998_v39, %v824_v29  ;;  %v639_v1 = vmul.f32 %v1918_v30, %v1213_v47  ;;  %v1231_v8 = vld [vmem:[%s1879_s20 + $0x70] sm:$0xff] }
  0xa8   : > { %v643_v59 = vadd.f32 %v635_v41, %v597_v45  ;;  %v828_v62 = vadd.f32 %v821_v28, %v783_v50  ;;  %v773_v3 = vmul.f32 %v1934_v43, %v1235_v55  ;;  %v453_v4 = vmul.f32 %v1227_v52, %v1903_v19  ;;  %v1248_v15 = vld [vmem:[%s1879_s20 + $0x71] sm:$0xff] }
  0xa9   : > { %v860_v35 = vadd.f32 %v1998_v39, %v827_v17  ;;  %v510_v56 = vadd.f32 %v502_v21, %v456_v38  ;;  %v865_v58 = vmax.f32 %v857_v44, 0.0  ;;  %v499_v5 = vmul.f32 %v1235_v55, %v1907_v22  ;;  %v1219_v25 = vld [vmem:[%s1879_s20 + $0x131] sm:$0xff] }
  0xaa   : > { %v688_v0 = vadd.f32 %v680_v33, %v643_v59  ;;  %v861_v6 = vadd.f32 %v1998_v39, %v828_v62  ;;  %v684_v40 = vmul.f32 %v1921_v32, %v1222_v61  ;;  %v544_v9 = vmul.f32 %v1244_v42, %v1910_v24  ;;  %v1205_v31 = vld [vmem:[%s1879_s20 + $0x170] sm:$0xff] }
  0xab   : > { %v868_v48 = vmax.f32 %v860_v35, 0.0  ;;  %v555_v63 = vadd.f32 %v547_v46, %v510_v56  ;;  %1317 = vmatmul.mubr.f32.vlgmr.msra.gmra.mrb[0].mxu0 %v865_v58  ;;  %v818_v13 = vmul.f32 %v1940_v49, %v1244_v42  ;;  %v507_v16 = vadd.f32 %v499_v5, %v453_v4  ;;  %v1214_v44 = vld [vmem:[%s1879_s20 + $0x1f0] sm:$0xff] }
  0xac   : > { %v732_v12 = vadd.f32 %v725_v60, %v688_v0  ;;  %v590_v18 = vmul.f32 %v1914_v27, %v1201_v2  ;;  %v869_v11 = vmax.f32 %v861_v6, 0.0  ;;  %v729_v23 = vmul.f32 %v1925_v37, %v1231_v8  ;;  %v711_v60 = vld [vmem:[%s1889_s29] sm:$0xff] }
  0xad   : > { %1322 = vmatprep.mubr.f32.mxu1 %v868_v48  ;;  %v601_v7 = vadd.f32 %v593_v57, %v555_v63  ;;  %v552_v26 = vadd.f32 %v544_v9, %v507_v16  ;;  %v636_v28 = vmul.f32 %v1918_v30, %v1210_v10  ;;  %v457_v29 = vmul.f32 %v1231_v8, %v1903_v19  ;;  %v1240_v63 = vld [vmem:[%s1889_s29 + $0x10] sm:$0xff] }
  0xae   : > { %v780_v17 = vadd.f32 %v773_v3, %v732_v12  ;;  %1323 = vmatmul.mubr.f32.vlgmr.msra.gmra.mrb[0].mxu1 %v869_v11  ;;  %v777_v33 = vmul.f32 %v1934_v43, %v1239_v14  ;;  %v503_v34 = vmul.f32 %v1239_v14, %v1907_v22  ;;  %v548_v35 = vmul.f32 %v1248_v15, %v1910_v24  ;;  %v1223_v24 = vld [vmem:[%s1879_s20 + $0x171] sm:$0xff]  ;;  %v804_v3 = vld [vmem:[%s1889_s29 + $0x1] sm:$0xff]  ;;  %s1548_s20 = scalar_lea.vmem %s1547_s17, 2048 }
  0xaf   : > { %v647_v20 = vadd.f32 %v639_v1, %v601_v7  ;;  %v598_v38 = vadd.f32 %v590_v18, %v552_v26  ;;  %v681_v21 = vmul.f32 %v1921_v32, %v1219_v25  ;;  %v822_v46 = vmul.f32 %v1940_v49, %v1248_v15  ;;  %p1550_p1 = scmp.lt.s32.totalorder %s1548_s20, %s1542_s24 }
  0xb0   : > { %v825_v36 = vadd.f32 %v818_v13, %v780_v17  ;;  %v511_v19 = vadd.f32 %v503_v34, %v457_v29  ;;  %v594_v47 = vmul.f32 %v1914_v27, %v1205_v31  ;;  %v726_v22 = vmul.f32 %v1925_v37, %v1944_v51 }
  0xb1   : > { %v692_v41 = vadd.f32 %v684_v40, %v647_v20  ;;  %v644_v50 = vadd.f32 %v636_v28, %v598_v38  ;;  %v640_v56 = vmul.f32 %v1918_v30, %v1214_v44  ;;  %v774_v59 = vmul.f32 %v1934_v43, %v1949_v53  ;;  %p1551_p2 = por %p1550_p1, %p1549_p13 }
  0xb2   : > { %v858_v48 = vadd.f32 %v1998_v39, %v825_v36  ;;  %v556_v55 = vadd.f32 %v548_v35, %v511_v19  ;;  %v685_v61 = vmul.f32 %v1921_v32, %v1223_v24  ;;  %v819_v51 = vmul.f32 %v1940_v49, %v1952_v54 }
  0xb3   : > { %v736_v45 = vadd.f32 %v729_v23, %v692_v41  ;;  %v689_v58 = vadd.f32 %v681_v21, %v644_v50  ;;  %v746_v2 = vmul.f32 %v1925_v37, %v711_v60  ;;  %v793_v5 = vmul.f32 %v1934_v43, %v1240_v63  ;;  %v1251_v43 = vld [vmem:[%s2155_s5] ss:$0 sm:$0xff]  ;;  %p1552_p6 = pnand %p1551_p2, %p1545_p12 }
  0xb4   : > { %v866_v57 = vmax.f32 %v858_v48, 0.0  ;;  %v602_v42 = vadd.f32 %v594_v47, %v556_v55  ;;  %v838_v7 = vmul.f32 %v1940_v49, %v804_v3 }
  0xb5   : > { %v784_v52 = vadd.f32 %v777_v33, %v736_v45  ;;  %v733_v62 = vadd.f32 %v726_v22, %v689_v58 }
  0xb6   : > { %1319 = vmatprep.mubr.f32.mxu0 %v866_v57  ;;  %v648_v30 = vadd.f32 %v640_v56, %v602_v42 }
  0xb7   : > { %v829_v27 = vadd.f32 %v822_v46, %v784_v52  ;;  %v781_v0 = vadd.f32 %v774_v59, %v733_v62 }
  0xb8   : > { %v693_v53 = vadd.f32 %v685_v61, %v648_v30 }
  0xb9   : > { %v862_v1 = vadd.f32 %v1998_v39, %v829_v27  ;;  %v826_v6 = vadd.f32 %v819_v51, %v781_v0 }
  0xba   : > { %v747_v32 = vadd.f32 %v746_v2, %v693_v53 }
  0xbb   : > { %v870_v4 = vmax.f32 %v862_v1, 0.0  ;;  %v859_v54 = vadd.f32 %v1998_v39, %v826_v6 }
  0xbc   : > { %v794_v40 = vadd.f32 %v793_v5, %v747_v32 }
  0xbd   : > { %1325 = vmatprep.mubr.f32.mxu1 %v870_v4  ;;  %v867_v8 = vmax.f32 %v859_v54, 0.0 }
  0xbe   : > { %v839_v9 = vadd.f32 %v838_v7, %v794_v40 }
  0xbf   : > { %1320 = vmatmul.mubr.f32.gmra.mrb[2].mxu0 %v867_v8 }
  0xc0   : > { %v863_v37 = vadd.f32 %v1998_v39, %v839_v9 }
  0xc2   : > { %v871_v10 = vmax.f32 %v863_v37, 0.0 }
  0xc4   : > { %1326 = vmatmul.mubr.f32.gmra.mrb[2].mxu1 %v871_v10 }
 0x17e   : > { %v1318_v12 = vpop.f32.mrb[0].mxu0 }
 0x17f   : > { %v967_v13 = vadd.f32 %v1318_v12, %v1251_v43  ;;  %v961_v14 = vpop.f32.mrb[1].mxu0 }
 0x180   : > { %v962_v15 = vadd.f32 %v1251_v43, %v961_v14 }
 0x181   : > { %v1001_v49 = vmax.f32 %v967_v13, 0.0  ;;  %v1324_v18 = vpop.f32.mrb[0].mxu1 }
 0x182   : > { %v1000_v16 = vmax.f32 %v962_v15, 0.0  ;;  %v987_v11 = vadd.f32 %v1324_v18, %v1251_v43  ;;  %v981_v39 = vpop.f32.mrb[1].mxu1 }
 0x183   : > { %1009 = vst [vmem:[%s417_s12 + $0x8] sm:$0xff] %v1001_v49  ;;  %v982_v20 = vadd.f32 %v1251_v43, %v981_v39 }
 0x184   : > { %1008 = vst [vmem:[%s417_s12] sm:$0xff] %v1000_v16  ;;  %v1005_v23 = vmax.f32 %v987_v11, 0.0 }
 0x185   : > { %v1004_v25 = vmax.f32 %v982_v20, 0.0 }
 0x186   : > { %1013 = vst [vmem:[%s417_s12 + $0x28] sm:$0xff] %v1005_v23 }
 0x187   : > { %1012 = vst [vmem:[%s417_s12 + $0x20] sm:$0xff] %v1004_v25 }
 0x192   : > { %v1321_v17 = vpop.f32.mrb[2].mxu0 }
 0x193   : > { %v977_v26 = vadd.f32 %v1321_v17, %v1251_v43  ;;  %v971_v28 = vpop.f32.mrb[3].mxu0 }
 0x194   : > { %v972_v29 = vadd.f32 %v1251_v43, %v971_v28 }
 0x195   : > { %v1003_v31 = vmax.f32 %v977_v26, 0.0 }
 0x196   : > { %v1002_v41 = vmax.f32 %v972_v29, 0.0 }
 0x197   : > { %1011 = vst [vmem:[%s417_s12 + $0x18] sm:$0xff] %v1003_v31  ;;  %v1327_v33 = vpop.f32.mrb[2].mxu1 }
 0x198   : > { %v997_v34 = vadd.f32 %v1327_v33, %v1251_v43  ;;  %1010 = vst [vmem:[%s417_s12 + $0x10] sm:$0xff] %v1002_v41  ;;  %v991_v35 = vpop.f32.mrb[3].mxu1 }
 0x199   : > { %v992_v36 = vadd.f32 %v1251_v43, %v991_v35 }
 0x19a   : > { %v1007_v38 = vmax.f32 %v997_v34, 0.0 }
 0x19b   : > { %v1006_v21 = vmax.f32 %v992_v36, 0.0 }
 0x19c   : > { %1015 = vst [vmem:[%s417_s12 + $0x38] sm:$0xff] %v1007_v38 }
 0x19d   : > { %1014 = vst [vmem:[%s417_s12 + $0x30] sm:$0xff] %v1006_v21 }
 0x19e   : > { %1555 = shalt.err (!%p1552_p6)
}
 0x19f   : > { %s1556_s0 = scalar_lea.hbm %s2101_s11, 1024  ;;  %s1560_s29 = scalar_lea.hbm %s2156_s6, 2048 }
 0x1a0   : > { %p1557_p4 = scmp.ne.s32.totalorder %s2101_s11, %s1556_s0  ;;  %p1561_p11 = scmp.lt.u32.totalorder %s2101_s11, %s2156_s6 }
 0x1a1   : > { %p1562_p0 = scmp.lt.u32.totalorder %s1560_s29, %s1556_s0  ;;  %p1564_p10 = scmp.lt.u32.totalorder %s1556_s0, %s2101_s11 }
 0x1a2   : > { %p1558_p8 = pnand %p1557_p4, %p2184_p7 }
 0x1a3   : > { %p1563_p3 = por %p1562_p0, %p1561_p11 }
 0x1a4   : > { %p1559_p9 = pneg %p1558_p8 }
 0x1a5   : > { %p1565_p12 = por %p1564_p10, %p1563_p3 }
 0x1a7   : > { %p1566_p13 = pnand %p1565_p12, %p1559_p9 }
 0x1a9   : > { %1569 = shalt.err (!%p1566_p13)
}
 0x1aa   : > { %s1655_s30 = smov 128   ;;  %s1656_s14 = smov 8  }
 0x1ab   : > { %1402 = dma.vmem_to_hbm [thread:$0]  (%p2184_p7), %s2096_s8, 1024, %s2101_s11, %s1017_s16, %s1655_s30, %s1655_s30, %s1656_s14  }
 0x1ac PF: > { %s2185_s12 = sld [smem:[#allocation23_spill]]  ;;  %s2186_s18 = sld [smem:[#allocation26_spill]] }
 0x1b2   : > { %s1047_s15 = sand.u32 1, %s2185_s12   ;;  %p2187_p1 = scmp.ne.s32.totalorder %s2186_s18, 0 }
 0x1b3   : > { %s1048_s21 = scalar_lea.sflag [#allocation5], %s1047_s15 }
 0x1b4   : > { %p1412_p2 = pnand %p1170_p5, %p2187_p1 }
 0x1b6   : > { %1611 = dma.done.wait (!%p1412_p2), %s1048_s21, 1024  }
 0x1b7   : > { %1613 = vsyncadd (!%p1412_p2), %s1048_s21, 4294966272  ;;  %s26_s26 = sadd.s32 1, %s1636_s26   ;;  %s2188_s24 = sld [smem:[#allocation25_spill]] }
 0x1b8   : > { %p23_p6 = scmp.ge.s32.totalorder %s26_s26, 4   ;;  %s2189_s10 = sld [smem:[#allocation24_spill]] }
 0x1b9   : > { %s2190_s21 = smov %s1620_s22  ;;  %s2191_s22 = smov %s1624_s23 }
 0x1ba   :  { %25 = sbr.rel (!%p23_p6) target bundleno = 11 (0xb), region = 127 }
 0x1bd   : > { %s2192_s23 = smov %s2188_s24  ;;  %s2193_s24 = smov %s1632_s25 }
 0x1be   : > { %s2194_s25 = smov %s2189_s10 }
 0x1c1   :  { %1053 = vsyncpa [#allocation4], 1 }
 0x1c2   :  { %1055 = vsyncpa [#allocation4 + $0x1], 1 }
 0x1c3   :  { %1056 = vsyncpa [#allocation7], 1 }
 0x1c4   :  { %1058 = vsyncpa [#allocation7 + $0x1], 1 }
 0x1c5   :  { %1059 = vsyncpa [#allocation10], 1 }
 0x1c6   :  { %1060 = vsyncpa [#allocation5], 1 }
 0x1c7   :  { %1062 = vsyncpa [#allocation5 + $0x1], 1 }

</bundles_post_ra>
